<compile_context>
chip_gen: v7x
topology: tpu7x:2x2x1
jax: 0.10.0
libtpu: 0.0.40
codegen_flags: <defaults>
</compile_context>

<pallas_src>
import jax
import jax.numpy as jnp
from jax import lax
from jax.experimental import pallas as pl
from jax.experimental.pallas import tpu as pltpu


def _round_up(a, b):
    return (a + b - 1) // b * b


def _make_gru_kernel(*, seq_len, time_block, hp, outer_unroll):
    S, T, HP = seq_len, time_block, hp
    SUB = 8                       # inner unrolled window = one f32 sublane tile
    num_sub = T // SUB
    last_row = (S - 1) % T        # hs_scratch row holding h after the true last step

    def kernel(x_ref, h0_ref, wih_ref, whh_ref, bgi_ref, bhn_ref,
               wdec_ref, bdec_ref,
               out_ref, hN_ref,
               gi_scratch, hs_scratch, h_carry):
        b = pl.program_id(0)

        # Initialize carried hidden state on the first time block.
        @pl.when(b == 0)
        def _():
            h_carry[...] = h0_ref[...]

        # Hoisted input projection for the whole block (bf16 MXU, f32 accumulate);
        # b_ih (+ b_hh for r/z gates) folded into bgi so the serial loop only adds gh.
        gi_scratch[...] = (
            jnp.dot(x_ref[...].astype(jnp.bfloat16), wih_ref[...],
                    preferred_element_type=jnp.float32)
            + bgi_ref[...])

        bhn = bhn_ref[...]        # (1, HP) b_hh for the n gate (must stay inside r*(...))

        def sub_block(sb, h):
            base = pl.multiple_of(sb * SUB, SUB)
            # One full-tile (8, 3*HP) load instead of 8 single-sublane masked loads.
            gi_tile = gi_scratch[pl.ds(base, SUB), :]
            rows = []
            for t in range(SUB):
                gi_t = gi_tile[t:t + 1, :]                          # static sublane slice
                gh = jnp.dot(h.astype(jnp.bfloat16), whh_ref[...],
                             preferred_element_type=jnp.float32)    # (1, 3*HP)
                # Gate slices are 128-lane aligned thanks to HP padding.
                r = jax.nn.sigmoid(gi_t[:, 0:HP] + gh[:, 0:HP])
                z = jax.nn.sigmoid(gi_t[:, HP:2 * HP] + gh[:, HP:2 * HP])
                n = jnp.tanh(gi_t[:, 2 * HP:3 * HP]
                             + r * (gh[:, 2 * HP:3 * HP] + bhn))
                h = (1.0 - z) * n + z * h
                rows.append(h)
            # One (8, HP) store per sub-block instead of 8 single-sublane stores.
            hs_scratch[pl.ds(base, SUB), :] = jnp.concatenate(rows, axis=0)
            return h

        h_final = lax.fori_loop(0, num_sub, sub_block, h_carry[...],
                                unroll=outer_unroll)
        h_carry[...] = h_final

        # Hoisted decoder: one (T, HP) x (HP, OP) bf16 matmul + one lane-dense slab store.
        out_ref[...] = (
            jnp.dot(hs_scratch[...].astype(jnp.bfloat16), wdec_ref[...],
                    preferred_element_type=jnp.float32)
            + bdec_ref[...]).astype(out_ref.dtype)

        # Padded timesteps are never masked on the serial path: they only exist in the
        # last block, their decoder rows are sliced off by the wrapper, and the true final
        # hidden state is read back from hs_scratch at the real last step.
        @pl.when(b == pl.num_programs(0) - 1)
        def _():
            hN_ref[...] = hs_scratch[pl.ds(last_row, 1), :].astype(hN_ref.dtype)

    return kernel


def gru_rnn_forward(x, hidden, params, *, time_block=None, vmem_limit_bytes=None):
    """x: (S, I) float32, hidden: (1, H) float32.
    Returns (output (S, O), hidden (1, 1, H)) matching the PyTorch forward."""
    S, I = x.shape
    H = hidden.shape[1]
    O = params["w_dec"].shape[0]
    HP = _round_up(H, 128)                      # pad each gate to a 128-lane boundary
    OP = _round_up(O, 128)                      # lane-dense decoder output slab

    if time_block is None:
        # 256 amortizes per-grid-step overhead and feeds large MXU matmuls on v5e/v6e;
        # cap lower (e.g. 128) on v7x at realistic H if the scratch becomes VMEM-bound.
        time_block = min(256, _round_up(S, 8))
    T = _round_up(time_block, 8)
    S_pad = _round_up(S, T)
    num_blocks = S_pad // T

    f32, bf16 = jnp.float32, jnp.bfloat16
    w_ih = params["w_ih"].astype(f32)           # (3H, I)  gate order r, z, n
    w_hh = params["w_hh"].astype(f32)           # (3H, H)
    b_ih = params["b_ih"].astype(f32)
    b_hh = params["b_hh"].astype(f32)
    w_dec = params["w_dec"].astype(f32)         # (O, H)
    b_dec = params["b_dec"].astype(f32)

    # Gate-padded, transposed weights: columns [g*HP, g*HP+H) hold gate g, rest zero.
    wih_p = jnp.zeros((I, 3 * HP), f32)
    whh_p = jnp.zeros((HP, 3 * HP), f32)
    for g in range(3):
        wih_p = wih_p.at[:, g * HP:g * HP + H].set(w_ih[g * H:(g + 1) * H, :].T)
        whh_p = whh_p.at[:H, g * HP:g * HP + H].set(w_hh[g * H:(g + 1) * H, :].T)
    wih_b = wih_p.astype(bf16)                  # bf16 MXU operands (f32 accumulation)
    whh_b = whh_p.astype(bf16)

    # Fold biases off the serial path: r/z gates get b_ih + b_hh, n gate gets b_ih only
    # (b_hh_n must stay inside the r*(...) term).
    bgi = jnp.zeros((1, 3 * HP), f32)
    bgi = bgi.at[0, 0:H].set(b_ih[0:H] + b_hh[0:H])
    bgi = bgi.at[0, HP:HP + H].set(b_ih[H:2 * H] + b_hh[H:2 * H])
    bgi = bgi.at[0, 2 * HP:2 * HP + H].set(b_ih[2 * H:3 * H])
    bhn = jnp.zeros((1, HP), f32).at[0, :H].set(b_hh[2 * H:3 * H])

    wdec_b = jnp.zeros((HP, OP), f32).at[:H, :O].set(w_dec.T).astype(bf16)
    bdec = jnp.zeros((1, OP), f32).at[0, :O].set(b_dec)

    h0 = jnp.zeros((1, HP), f32).at[:, :H].set(hidden.astype(f32))

    x_p = x.astype(f32)
    if S_pad != S:
        x_p = jnp.pad(x_p, ((0, S_pad - S), (0, 0)))

    num_sub = T // 8
    outer_unroll = True if num_sub <= 4 else 2

    kernel = _make_gru_kernel(seq_len=S, time_block=T, hp=HP,
                              outer_unroll=outer_unroll)

    full2 = lambda shape: pl.BlockSpec(shape, lambda b: (0, 0))

    out_pad, hN = pl.pallas_call(
        kernel,
        out_shape=(
            jax.ShapeDtypeStruct((S_pad, OP), jnp.float32),
            jax.ShapeDtypeStruct((1, HP), jnp.float32),
        ),
        grid_spec=pltpu.PrefetchScalarGridSpec(
            num_scalar_prefetch=0,
            grid=(num_blocks,),
            in_specs=[
                pl.BlockSpec((T, I), lambda b: (b, 0)),   # x time-block (f32, cast in-kernel)
                full2((1, HP)),                           # h0 (padded)
                full2((I, 3 * HP)),                       # W_ih^T (bf16, gate-padded)
                full2((HP, 3 * HP)),                      # W_hh^T (bf16, gate-padded)
                full2((1, 3 * HP)),                       # folded input-proj bias (f32)
                full2((1, HP)),                           # b_hh (n gate, f32)
                full2((HP, OP)),                          # W_dec^T (bf16, padded)
                full2((1, OP)),                           # b_dec (padded)
            ],
            out_specs=[
                pl.BlockSpec((T, OP), lambda b: (b, 0)),  # lane-dense decoder slab
                full2((1, HP)),                           # final hidden (padded)
            ],
            scratch_shapes=[
                pltpu.VMEM((T, 3 * HP), jnp.float32),     # hoisted input projections
                pltpu.VMEM((T, HP), jnp.float32),         # per-step hidden states
                pltpu.VMEM((1, HP), jnp.float32),         # carried hidden state
            ],
        ),
        compiler_params=pltpu.CompilerParams(
            dimension_semantics=("arbitrary",),           # recurrence is sequential
            vmem_limit_bytes=vmem_limit_bytes),
    )(x_p, h0, wih_b, whh_b, bgi, bhn, wdec_b, bdec)

    out = out_pad[:S, :O]
    # nn.GRU returns hidden of shape (layers*bi, batch, hidden) = (1, 1, H)
    h_final = hN[:, :H].reshape(1, 1, H)
    return out, h_final


def make_params(key, input_size, hidden_size, output_size):
    ks = jax.random.split(key, 6)
    scale = 0.1
    return {
        # nn.GRU weight_ih_l0: (3H, I), weight_hh_l0: (3H, H), biases (3H,)
        "w_ih": scale * jax.random.normal(ks[0], (3 * hidden_size, input_size), jnp.float32),
        "w_hh": scale * jax.random.normal(ks[1], (3 * hidden_size, hidden_size), jnp.float32),
        "b_ih": scale * jax.random.normal(ks[2], (3 * hidden_size,), jnp.float32),
        "b_hh": scale * jax.random.normal(ks[3], (3 * hidden_size,), jnp.float32),
        # decoder Linear(hidden_size -> output_size)
        "w_dec": scale * jax.random.normal(ks[4], (output_size, hidden_size), jnp.float32),
        "b_dec": scale * jax.random.normal(ks[5], (output_size,), jnp.float32),
    }


def reference_forward(x, hidden, params):
    """Pure-JAX f32 reference of the PyTorch GRU forward for verification."""
    H = hidden.shape[1]
    h = hidden[0]

    def step(h, x_t):
        gi = x_t @ params["w_ih"].T + params["b_ih"]
        gh = h @ params["w_hh"].T + params["b_hh"]
        r = jax.nn.sigmoid(gi[:H] + gh[:H])
        z = jax.nn.sigmoid(gi[H:2 * H] + gh[H:2 * H])
        n = jnp.tanh(gi[2 * H:] + r * gh[2 * H:])
        h_new = (1.0 - z) * n + z * h
        return h_new, h_new

    h_final, hs = jax.lax.scan(step, h, x)
    out = hs @ params["w_dec"].T + params["b_dec"]
    return out, h_final.reshape(1, 1, H)


if __name__ == "__main__":
    input_size, hidden_size, output_size = 16, 32, 8
    seq_len = 8

    key = jax.random.PRNGKey(0)
    kx, kh, kp = jax.random.split(key, 3)
    x = jax.random.normal(kx, (seq_len, input_size), jnp.float32)
    hidden = jnp.zeros((1, hidden_size), jnp.float32)  # init_hidden(random=False)
    params = make_params(kp, input_size, hidden_size, output_size)

    out, h_final = gru_rnn_forward(x, hidden, params)
    out = jax.block_until_ready(out)
    h_final = jax.block_until_ready(h_final)

    ref_out, ref_h = reference_forward(x, hidden, params)
    assert out.shape == (seq_len, output_size)
    assert h_final.shape == (1, 1, hidden_size)
    # bf16 MXU operands (f32 accumulation) -> tolerances loosened vs the pure-f32 version.
    assert jnp.allclose(out, ref_out, atol=2e-2, rtol=2e-2)
    assert jnp.allclose(h_final, ref_h, atol=2e-2, rtol=2e-2)

    # Second check: sequence length not a multiple of the time block (exercises the
    # padded-tail path: outputs sliced off, final hidden read from the true last step).
    seq_len2 = 20
    x2 = jax.random.normal(jax.random.PRNGKey(1), (seq_len2, input_size), jnp.float32)
    out2, h2 = gru_rnn_forward(x2, hidden, params)
    out2 = jax.block_until_ready(out2)
    ref_out2, ref_h2 = reference_forward(x2, hidden, params)
    assert jnp.allclose(out2, ref_out2, atol=2e-2, rtol=2e-2)
    assert jnp.allclose(h2, ref_h2, atol=2e-2, rtol=2e-2)

    print("KERNEL_OK")
</pallas_src>

<mosaic_0001>
module attributes {stable_mosaic.version = 11 : i64} {
  func.func @kernel(%arg0: i32, %arg1: memref<8x16xf32, #tpu.memory_space<vmem>>, %arg2: memref<1x128xf32, #tpu.memory_space<vmem>>, %arg3: memref<16x384xbf16, #tpu.memory_space<vmem>>, %arg4: memref<128x384xbf16, #tpu.memory_space<vmem>>, %arg5: memref<1x384xf32, #tpu.memory_space<vmem>>, %arg6: memref<1x128xf32, #tpu.memory_space<vmem>>, %arg7: memref<128x128xbf16, #tpu.memory_space<vmem>>, %arg8: memref<1x128xf32, #tpu.memory_space<vmem>>, %arg9: memref<8x128xf32, #tpu.memory_space<vmem>>, %arg10: memref<1x128xf32, #tpu.memory_space<vmem>>, %arg11: memref<8x384xf32, #tpu.memory_space<vmem>>, %arg12: memref<8x128xf32, #tpu.memory_space<vmem>>, %arg13: memref<1x128xf32, #tpu.memory_space<vmem>>) attributes {dimension_semantics = [#tpu.dimension_semantics<arbitrary>], iteration_bounds = array<i64: 1>, scalar_prefetch = 0 : i64, scratch_operands = 3 : i64, tpu.core_type = #tpu.core_type<tc>, window_params = [{transform_indices = @transform_0, window_bounds = array<i64: 8, 16>}, {pipeline_mode = #tpu.pipeline_mode<synchronous>, transform_indices = @transform_1, window_bounds = array<i64: 1, 128>}, {pipeline_mode = #tpu.pipeline_mode<synchronous>, transform_indices = @transform_2, window_bounds = array<i64: 16, 384>}, {pipeline_mode = #tpu.pipeline_mode<synchronous>, transform_indices = @transform_3, window_bounds = array<i64: 128, 384>}, {pipeline_mode = #tpu.pipeline_mode<synchronous>, transform_indices = @transform_4, window_bounds = array<i64: 1, 384>}, {pipeline_mode = #tpu.pipeline_mode<synchronous>, transform_indices = @transform_5, window_bounds = array<i64: 1, 128>}, {pipeline_mode = #tpu.pipeline_mode<synchronous>, transform_indices = @transform_6, window_bounds = array<i64: 128, 128>}, {pipeline_mode = #tpu.pipeline_mode<synchronous>, transform_indices = @transform_7, window_bounds = array<i64: 1, 128>}, {transform_indices = @transform_8, window_bounds = array<i64: 8, 128>}, {pipeline_mode = #tpu.pipeline_mode<synchronous>, transform_indices = @transform_9, window_bounds = array<i64: 1, 128>}]} {
    %c0_i32 = arith.constant 0 : i32
    %0 = arith.cmpi eq, %arg0, %c0_i32 : i32
    %1 = arith.extui %0 : i1 to i32
    %c0_i32_0 = arith.constant 0 : i32
    %2 = arith.cmpi ne, %1, %c0_i32_0 : i32
    scf.if %2 {
      %c0_76 = arith.constant 0 : index
      %c0_77 = arith.constant 0 : index
      %280 = vector.load %arg2[%c0_76, %c0_77] : memref<1x128xf32, #tpu.memory_space<vmem>>, vector<1x128xf32>
      %c0_78 = arith.constant 0 : index
      %c0_79 = arith.constant 0 : index
      %281 = vector.load %arg13[%c0_78, %c0_79] : memref<1x128xf32, #tpu.memory_space<vmem>>, vector<1x128xf32>
      tpu.vector_store %arg13[%c0_78, %c0_79], %280 {strides = array<i32>} : memref<1x128xf32, #tpu.memory_space<vmem>>, vector<1x128xf32>,
    } else {
    }
    %c0 = arith.constant 0 : index
    %c0_1 = arith.constant 0 : index
    %3 = vector.load %arg1[%c0, %c0_1] : memref<8x16xf32, #tpu.memory_space<vmem>>, vector<8x16xf32>
    %4 = arith.truncf %3 : vector<8x16xf32> to vector<8x16xbf16>
    %c0_2 = arith.constant 0 : index
    %c0_3 = arith.constant 0 : index
    %5 = vector.load %arg3[%c0_2, %c0_3] : memref<16x384xbf16, #tpu.memory_space<vmem>>, vector<16x384xbf16>
    %cst = arith.constant dense<0.000000e+00> : vector<8x384xf32>
    %6 = tpu.matmul %4, %5, %cst {dimension_numbers = #tpu.dot_dimension_numbers<[1], [0], [0], [1], [0, 0, 1, 1], [], []>} : vector<8x16xbf16>, vector<16x384xbf16>, vector<8x384xf32> -> vector<8x384xf32>
    %c0_4 = arith.constant 0 : index
    %c0_5 = arith.constant 0 : index
    %7 = vector.load %arg5[%c0_4, %c0_5] : memref<1x384xf32, #tpu.memory_space<vmem>>, vector<1x384xf32>
    %8 = vector.broadcast %7 : vector<1x384xf32> to vector<8x384xf32>
    %9 = arith.addf %6, %8 : vector<8x384xf32>
    %c0_6 = arith.constant 0 : index
    %c0_7 = arith.constant 0 : index
    %10 = vector.load %arg11[%c0_6, %c0_7] : memref<8x384xf32, #tpu.memory_space<vmem>>, vector<8x384xf32>
    tpu.vector_store %arg11[%c0_6, %c0_7], %9 {strides = array<i32>} : memref<8x384xf32, #tpu.memory_space<vmem>>, vector<8x384xf32>,
    %c0_8 = arith.constant 0 : index
    %c0_9 = arith.constant 0 : index
    %11 = vector.load %arg6[%c0_8, %c0_9] : memref<1x128xf32, #tpu.memory_space<vmem>>, vector<1x128xf32>
    %c0_10 = arith.constant 0 : index
    %c0_11 = arith.constant 0 : index
    %12 = vector.load %arg13[%c0_10, %c0_11] : memref<1x128xf32, #tpu.memory_space<vmem>>, vector<1x128xf32>
    %c0_i32_12 = arith.constant 0 : i32
    %c8_i32 = arith.constant 8 : i32
    %13 = arith.muli %c0_i32_12, %c8_i32 : i32
    %14 = tpu.assume_multiple %13, 8 : i32
    %15 = arith.index_cast %14 : i32 to index
    %c0_13 = arith.constant 0 : index
    %16 = vector.load %arg11[%15, %c0_13] : memref<8x384xf32, #tpu.memory_space<vmem>>, vector<8x384xf32>
    %17 = vector.extract_strided_slice %16 {offsets = [0, 0], sizes = [1, 384], strides = [1, 1]} : vector<8x384xf32> to vector<1x384xf32>
    %18 = arith.truncf %12 : vector<1x128xf32> to vector<1x128xbf16>
    %c0_14 = arith.constant 0 : index
    %c0_15 = arith.constant 0 : index
    %19 = vector.load %arg4[%c0_14, %c0_15] : memref<128x384xbf16, #tpu.memory_space<vmem>>, vector<128x384xbf16>
    %cst_16 = arith.constant dense<0.000000e+00> : vector<1x384xf32>
    %20 = tpu.matmul %18, %19, %cst_16 {dimension_numbers = #tpu.dot_dimension_numbers<[1], [0], [0], [1], [0, 0, 1, 1], [], []>} : vector<1x128xbf16>, vector<128x384xbf16>, vector<1x384xf32> -> vector<1x384xf32>
    %21 = vector.extract_strided_slice %17 {offsets = [0, 0], sizes = [1, 128], strides = [1, 1]} : vector<1x384xf32> to vector<1x128xf32>
    %22 = vector.extract_strided_slice %20 {offsets = [0, 0], sizes = [1, 128], strides = [1, 1]} : vector<1x384xf32> to vector<1x128xf32>
    %23 = arith.addf %21, %22 : vector<1x128xf32>
    %24 = arith.negf %23 : vector<1x128xf32>
    %25 = math.exp %24 : vector<1x128xf32>
    %cst_17 = arith.constant 1.000000e+00 : f32
    %26 = vector.broadcast %cst_17 : f32 to vector<1x128xf32>
    %27 = arith.addf %26, %25 : vector<1x128xf32>
    %28 = arith.divf %26, %27 : vector<1x128xf32>
    %29 = vector.extract_strided_slice %17 {offsets = [0, 128], sizes = [1, 128], strides = [1, 1]} : vector<1x384xf32> to vector<1x128xf32>
    %30 = vector.extract_strided_slice %20 {offsets = [0, 128], sizes = [1, 128], strides = [1, 1]} : vector<1x384xf32> to vector<1x128xf32>
    %31 = arith.addf %29, %30 : vector<1x128xf32>
    %32 = arith.negf %31 : vector<1x128xf32>
    %33 = math.exp %32 : vector<1x128xf32>
    %cst_18 = arith.constant 1.000000e+00 : f32
    %34 = vector.broadcast %cst_18 : f32 to vector<1x128xf32>
    %35 = arith.addf %34, %33 : vector<1x128xf32>
    %36 = arith.divf %34, %35 : vector<1x128xf32>
    %37 = vector.extract_strided_slice %17 {offsets = [0, 256], sizes = [1, 128], strides = [1, 1]} : vector<1x384xf32> to vector<1x128xf32>
    %38 = vector.extract_strided_slice %20 {offsets = [0, 256], sizes = [1, 128], strides = [1, 1]} : vector<1x384xf32> to vector<1x128xf32>
    %39 = arith.addf %38, %11 : vector<1x128xf32>
    %40 = arith.mulf %28, %39 : vector<1x128xf32>
    %41 = arith.addf %37, %40 : vector<1x128xf32>
    %42 = math.tanh %41 : vector<1x128xf32>
    %cst_19 = arith.constant 1.000000e+00 : f32
    %43 = vector.broadcast %cst_19 : f32 to vector<1x128xf32>
    %44 = arith.subf %43, %36 : vector<1x128xf32>
    %45 = arith.mulf %44, %42 : vector<1x128xf32>
    %46 = arith.mulf %36, %12 : vector<1x128xf32>
    %47 = arith.addf %45, %46 : vector<1x128xf32>
    %48 = vector.extract_strided_slice %16 {offsets = [1, 0], sizes = [1, 384], strides = [1, 1]} : vector<8x384xf32> to vector<1x384xf32>
    %49 = arith.truncf %47 : vector<1x128xf32> to vector<1x128xbf16>
    %c0_20 = arith.constant 0 : index
    %c0_21 = arith.constant 0 : index
    %50 = vector.load %arg4[%c0_20, %c0_21] : memref<128x384xbf16, #tpu.memory_space<vmem>>, vector<128x384xbf16>
    %cst_22 = arith.constant dense<0.000000e+00> : vector<1x384xf32>
    %51 = tpu.matmul %49, %50, %cst_22 {dimension_numbers = #tpu.dot_dimension_numbers<[1], [0], [0], [1], [0, 0, 1, 1], [], []>} : vector<1x128xbf16>, vector<128x384xbf16>, vector<1x384xf32> -> vector<1x384xf32>
    %52 = vector.extract_strided_slice %48 {offsets = [0, 0], sizes = [1, 128], strides = [1, 1]} : vector<1x384xf32> to vector<1x128xf32>
    %53 = vector.extract_strided_slice %51 {offsets = [0, 0], sizes = [1, 128], strides = [1, 1]} : vector<1x384xf32> to vector<1x128xf32>
    %54 = arith.addf %52, %53 : vector<1x128xf32>
    %55 = arith.negf %54 : vector<1x128xf32>
    %56 = math.exp %55 : vector<1x128xf32>
    %cst_23 = arith.constant 1.000000e+00 : f32
    %57 = vector.broadcast %cst_23 : f32 to vector<1x128xf32>
    %58 = arith.addf %57, %56 : vector<1x128xf32>
    %59 = arith.divf %57, %58 : vector<1x128xf32>
    %60 = vector.extract_strided_slice %48 {offsets = [0, 128], sizes = [1, 128], strides = [1, 1]} : vector<1x384xf32> to vector<1x128xf32>
    %61 = vector.extract_strided_slice %51 {offsets = [0, 128], sizes = [1, 128], strides = [1, 1]} : vector<1x384xf32> to vector<1x128xf32>
    %62 = arith.addf %60, %61 : vector<1x128xf32>
    %63 = arith.negf %62 : vector<1x128xf32>
    %64 = math.exp %63 : vector<1x128xf32>
    %cst_24 = arith.constant 1.000000e+00 : f32
    %65 = vector.broadcast %cst_24 : f32 to vector<1x128xf32>
    %66 = arith.addf %65, %64 : vector<1x128xf32>
    %67 = arith.divf %65, %66 : vector<1x128xf32>
    %68 = vector.extract_strided_slice %48 {offsets = [0, 256], sizes = [1, 128], strides = [1, 1]} : vector<1x384xf32> to vector<1x128xf32>
    %69 = vector.extract_strided_slice %51 {offsets = [0, 256], sizes = [1, 128], strides = [1, 1]} : vector<1x384xf32> to vector<1x128xf32>
    %70 = arith.addf %69, %11 : vector<1x128xf32>
    %71 = arith.mulf %59, %70 : vector<1x128xf32>
    %72 = arith.addf %68, %71 : vector<1x128xf32>
    %73 = math.tanh %72 : vector<1x128xf32>
    %cst_25 = arith.constant 1.000000e+00 : f32
    %74 = vector.broadcast %cst_25 : f32 to vector<1x128xf32>
    %75 = arith.subf %74, %67 : vector<1x128xf32>
    %76 = arith.mulf %75, %73 : vector<1x128xf32>
    %77 = arith.mulf %67, %47 : vector<1x128xf32>
    %78 = arith.addf %76, %77 : vector<1x128xf32>
    %79 = vector.extract_strided_slice %16 {offsets = [2, 0], sizes = [1, 384], strides = [1, 1]} : vector<8x384xf32> to vector<1x384xf32>
    %80 = arith.truncf %78 : vector<1x128xf32> to vector<1x128xbf16>
    %c0_26 = arith.constant 0 : index
    %c0_27 = arith.constant 0 : index
    %81 = vector.load %arg4[%c0_26, %c0_27] : memref<128x384xbf16, #tpu.memory_space<vmem>>, vector<128x384xbf16>
    %cst_28 = arith.constant dense<0.000000e+00> : vector<1x384xf32>
    %82 = tpu.matmul %80, %81, %cst_28 {dimension_numbers = #tpu.dot_dimension_numbers<[1], [0], [0], [1], [0, 0, 1, 1], [], []>} : vector<1x128xbf16>, vector<128x384xbf16>, vector<1x384xf32> -> vector<1x384xf32>
    %83 = vector.extract_strided_slice %79 {offsets = [0, 0], sizes = [1, 128], strides = [1, 1]} : vector<1x384xf32> to vector<1x128xf32>
    %84 = vector.extract_strided_slice %82 {offsets = [0, 0], sizes = [1, 128], strides = [1, 1]} : vector<1x384xf32> to vector<1x128xf32>
    %85 = arith.addf %83, %84 : vector<1x128xf32>
    %86 = arith.negf %85 : vector<1x128xf32>
    %87 = math.exp %86 : vector<1x128xf32>
    %cst_29 = arith.constant 1.000000e+00 : f32
    %88 = vector.broadcast %cst_29 : f32 to vector<1x128xf32>
    %89 = arith.addf %88, %87 : vector<1x128xf32>
    %90 = arith.divf %88, %89 : vector<1x128xf32>
    %91 = vector.extract_strided_slice %79 {offsets = [0, 128], sizes = [1, 128], strides = [1, 1]} : vector<1x384xf32> to vector<1x128xf32>
    %92 = vector.extract_strided_slice %82 {offsets = [0, 128], sizes = [1, 128], strides = [1, 1]} : vector<1x384xf32> to vector<1x128xf32>
    %93 = arith.addf %91, %92 : vector<1x128xf32>
    %94 = arith.negf %93 : vector<1x128xf32>
    %95 = math.exp %94 : vector<1x128xf32>
    %cst_30 = arith.constant 1.000000e+00 : f32
    %96 = vector.broadcast %cst_30 : f32 to vector<1x128xf32>
    %97 = arith.addf %96, %95 : vector<1x128xf32>
    %98 = arith.divf %96, %97 : vector<1x128xf32>
    %99 = vector.extract_strided_slice %79 {offsets = [0, 256], sizes = [1, 128], strides = [1, 1]} : vector<1x384xf32> to vector<1x128xf32>
    %100 = vector.extract_strided_slice %82 {offsets = [0, 256], sizes = [1, 128], strides = [1, 1]} : vector<1x384xf32> to vector<1x128xf32>
    %101 = arith.addf %100, %11 : vector<1x128xf32>
    %102 = arith.mulf %90, %101 : vector<1x128xf32>
    %103 = arith.addf %99, %102 : vector<1x128xf32>
    %104 = math.tanh %103 : vector<1x128xf32>
    %cst_31 = arith.constant 1.000000e+00 : f32
    %105 = vector.broadcast %cst_31 : f32 to vector<1x128xf32>
    %106 = arith.subf %105, %98 : vector<1x128xf32>
    %107 = arith.mulf %106, %104 : vector<1x128xf32>
    %108 = arith.mulf %98, %78 : vector<1x128xf32>
    %109 = arith.addf %107, %108 : vector<1x128xf32>
    %110 = vector.extract_strided_slice %16 {offsets = [3, 0], sizes = [1, 384], strides = [1, 1]} : vector<8x384xf32> to vector<1x384xf32>
    %111 = arith.truncf %109 : vector<1x128xf32> to vector<1x128xbf16>
    %c0_32 = arith.constant 0 : index
    %c0_33 = arith.constant 0 : index
    %112 = vector.load %arg4[%c0_32, %c0_33] : memref<128x384xbf16, #tpu.memory_space<vmem>>, vector<128x384xbf16>
    %cst_34 = arith.constant dense<0.000000e+00> : vector<1x384xf32>
    %113 = tpu.matmul %111, %112, %cst_34 {dimension_numbers = #tpu.dot_dimension_numbers<[1], [0], [0], [1], [0, 0, 1, 1], [], []>} : vector<1x128xbf16>, vector<128x384xbf16>, vector<1x384xf32> -> vector<1x384xf32>
    %114 = vector.extract_strided_slice %110 {offsets = [0, 0], sizes = [1, 128], strides = [1, 1]} : vector<1x384xf32> to vector<1x128xf32>
    %115 = vector.extract_strided_slice %113 {offsets = [0, 0], sizes = [1, 128], strides = [1, 1]} : vector<1x384xf32> to vector<1x128xf32>
    %116 = arith.addf %114, %115 : vector<1x128xf32>
    %117 = arith.negf %116 : vector<1x128xf32>
    %118 = math.exp %117 : vector<1x128xf32>
    %cst_35 = arith.constant 1.000000e+00 : f32
    %119 = vector.broadcast %cst_35 : f32 to vector<1x128xf32>
    %120 = arith.addf %119, %118 : vector<1x128xf32>
    %121 = arith.divf %119, %120 : vector<1x128xf32>
    %122 = vector.extract_strided_slice %110 {offsets = [0, 128], sizes = [1, 128], strides = [1, 1]} : vector<1x384xf32> to vector<1x128xf32>
    %123 = vector.extract_strided_slice %113 {offsets = [0, 128], sizes = [1, 128], strides = [1, 1]} : vector<1x384xf32> to vector<1x128xf32>
    %124 = arith.addf %122, %123 : vector<1x128xf32>
    %125 = arith.negf %124 : vector<1x128xf32>
    %126 = math.exp %125 : vector<1x128xf32>
    %cst_36 = arith.constant 1.000000e+00 : f32
    %127 = vector.broadcast %cst_36 : f32 to vector<1x128xf32>
    %128 = arith.addf %127, %126 : vector<1x128xf32>
    %129 = arith.divf %127, %128 : vector<1x128xf32>
    %130 = vector.extract_strided_slice %110 {offsets = [0, 256], sizes = [1, 128], strides = [1, 1]} : vector<1x384xf32> to vector<1x128xf32>
    %131 = vector.extract_strided_slice %113 {offsets = [0, 256], sizes = [1, 128], strides = [1, 1]} : vector<1x384xf32> to vector<1x128xf32>
    %132 = arith.addf %131, %11 : vector<1x128xf32>
    %133 = arith.mulf %121, %132 : vector<1x128xf32>
    %134 = arith.addf %130, %133 : vector<1x128xf32>
    %135 = math.tanh %134 : vector<1x128xf32>
    %cst_37 = arith.constant 1.000000e+00 : f32
    %136 = vector.broadcast %cst_37 : f32 to vector<1x128xf32>
    %137 = arith.subf %136, %129 : vector<1x128xf32>
    %138 = arith.mulf %137, %135 : vector<1x128xf32>
    %139 = arith.mulf %129, %109 : vector<1x128xf32>
    %140 = arith.addf %138, %139 : vector<1x128xf32>
    %141 = vector.extract_strided_slice %16 {offsets = [4, 0], sizes = [1, 384], strides = [1, 1]} : vector<8x384xf32> to vector<1x384xf32>
    %142 = arith.truncf %140 : vector<1x128xf32> to vector<1x128xbf16>
    %c0_38 = arith.constant 0 : index
    %c0_39 = arith.constant 0 : index
    %143 = vector.load %arg4[%c0_38, %c0_39] : memref<128x384xbf16, #tpu.memory_space<vmem>>, vector<128x384xbf16>
    %cst_40 = arith.constant dense<0.000000e+00> : vector<1x384xf32>
    %144 = tpu.matmul %142, %143, %cst_40 {dimension_numbers = #tpu.dot_dimension_numbers<[1], [0], [0], [1], [0, 0, 1, 1], [], []>} : vector<1x128xbf16>, vector<128x384xbf16>, vector<1x384xf32> -> vector<1x384xf32>
    %145 = vector.extract_strided_slice %141 {offsets = [0, 0], sizes = [1, 128], strides = [1, 1]} : vector<1x384xf32> to vector<1x128xf32>
    %146 = vector.extract_strided_slice %144 {offsets = [0, 0], sizes = [1, 128], strides = [1, 1]} : vector<1x384xf32> to vector<1x128xf32>
    %147 = arith.addf %145, %146 : vector<1x128xf32>
    %148 = arith.negf %147 : vector<1x128xf32>
    %149 = math.exp %148 : vector<1x128xf32>
    %cst_41 = arith.constant 1.000000e+00 : f32
    %150 = vector.broadcast %cst_41 : f32 to vector<1x128xf32>
    %151 = arith.addf %150, %149 : vector<1x128xf32>
    %152 = arith.divf %150, %151 : vector<1x128xf32>
    %153 = vector.extract_strided_slice %141 {offsets = [0, 128], sizes = [1, 128], strides = [1, 1]} : vector<1x384xf32> to vector<1x128xf32>
    %154 = vector.extract_strided_slice %144 {offsets = [0, 128], sizes = [1, 128], strides = [1, 1]} : vector<1x384xf32> to vector<1x128xf32>
    %155 = arith.addf %153, %154 : vector<1x128xf32>
    %156 = arith.negf %155 : vector<1x128xf32>
    %157 = math.exp %156 : vector<1x128xf32>
    %cst_42 = arith.constant 1.000000e+00 : f32
    %158 = vector.broadcast %cst_42 : f32 to vector<1x128xf32>
    %159 = arith.addf %158, %157 : vector<1x128xf32>
    %160 = arith.divf %158, %159 : vector<1x128xf32>
    %161 = vector.extract_strided_slice %141 {offsets = [0, 256], sizes = [1, 128], strides = [1, 1]} : vector<1x384xf32> to vector<1x128xf32>
    %162 = vector.extract_strided_slice %144 {offsets = [0, 256], sizes = [1, 128], strides = [1, 1]} : vector<1x384xf32> to vector<1x128xf32>
    %163 = arith.addf %162, %11 : vector<1x128xf32>
    %164 = arith.mulf %152, %163 : vector<1x128xf32>
    %165 = arith.addf %161, %164 : vector<1x128xf32>
    %166 = math.tanh %165 : vector<1x128xf32>
    %cst_43 = arith.constant 1.000000e+00 : f32
    %167 = vector.broadcast %cst_43 : f32 to vector<1x128xf32>
    %168 = arith.subf %167, %160 : vector<1x128xf32>
    %169 = arith.mulf %168, %166 : vector<1x128xf32>
    %170 = arith.mulf %160, %140 : vector<1x128xf32>
    %171 = arith.addf %169, %170 : vector<1x128xf32>
    %172 = vector.extract_strided_slice %16 {offsets = [5, 0], sizes = [1, 384], strides = [1, 1]} : vector<8x384xf32> to vector<1x384xf32>
    %173 = arith.truncf %171 : vector<1x128xf32> to vector<1x128xbf16>
    %c0_44 = arith.constant 0 : index
    %c0_45 = arith.constant 0 : index
    %174 = vector.load %arg4[%c0_44, %c0_45] : memref<128x384xbf16, #tpu.memory_space<vmem>>, vector<128x384xbf16>
    %cst_46 = arith.constant dense<0.000000e+00> : vector<1x384xf32>
    %175 = tpu.matmul %173, %174, %cst_46 {dimension_numbers = #tpu.dot_dimension_numbers<[1], [0], [0], [1], [0, 0, 1, 1], [], []>} : vector<1x128xbf16>, vector<128x384xbf16>, vector<1x384xf32> -> vector<1x384xf32>
    %176 = vector.extract_strided_slice %172 {offsets = [0, 0], sizes = [1, 128], strides = [1, 1]} : vector<1x384xf32> to vector<1x128xf32>
    %177 = vector.extract_strided_slice %175 {offsets = [0, 0], sizes = [1, 128], strides = [1, 1]} : vector<1x384xf32> to vector<1x128xf32>
    %178 = arith.addf %176, %177 : vector<1x128xf32>
    %179 = arith.negf %178 : vector<1x128xf32>
    %180 = math.exp %179 : vector<1x128xf32>
    %cst_47 = arith.constant 1.000000e+00 : f32
    %181 = vector.broadcast %cst_47 : f32 to vector<1x128xf32>
    %182 = arith.addf %181, %180 : vector<1x128xf32>
    %183 = arith.divf %181, %182 : vector<1x128xf32>
    %184 = vector.extract_strided_slice %172 {offsets = [0, 128], sizes = [1, 128], strides = [1, 1]} : vector<1x384xf32> to vector<1x128xf32>
    %185 = vector.extract_strided_slice %175 {offsets = [0, 128], sizes = [1, 128], strides = [1, 1]} : vector<1x384xf32> to vector<1x128xf32>
    %186 = arith.addf %184, %185 : vector<1x128xf32>
    %187 = arith.negf %186 : vector<1x128xf32>
    %188 = math.exp %187 : vector<1x128xf32>
    %cst_48 = arith.constant 1.000000e+00 : f32
    %189 = vector.broadcast %cst_48 : f32 to vector<1x128xf32>
    %190 = arith.addf %189, %188 : vector<1x128xf32>
    %191 = arith.divf %189, %190 : vector<1x128xf32>
    %192 = vector.extract_strided_slice %172 {offsets = [0, 256], sizes = [1, 128], strides = [1, 1]} : vector<1x384xf32> to vector<1x128xf32>
    %193 = vector.extract_strided_slice %175 {offsets = [0, 256], sizes = [1, 128], strides = [1, 1]} : vector<1x384xf32> to vector<1x128xf32>
    %194 = arith.addf %193, %11 : vector<1x128xf32>
    %195 = arith.mulf %183, %194 : vector<1x128xf32>
    %196 = arith.addf %192, %195 : vector<1x128xf32>
    %197 = math.tanh %196 : vector<1x128xf32>
    %cst_49 = arith.constant 1.000000e+00 : f32
    %198 = vector.broadcast %cst_49 : f32 to vector<1x128xf32>
    %199 = arith.subf %198, %191 : vector<1x128xf32>
    %200 = arith.mulf %199, %197 : vector<1x128xf32>
    %201 = arith.mulf %191, %171 : vector<1x128xf32>
    %202 = arith.addf %200, %201 : vector<1x128xf32>
    %203 = vector.extract_strided_slice %16 {offsets = [6, 0], sizes = [1, 384], strides = [1, 1]} : vector<8x384xf32> to vector<1x384xf32>
    %204 = arith.truncf %202 : vector<1x128xf32> to vector<1x128xbf16>
    %c0_50 = arith.constant 0 : index
    %c0_51 = arith.constant 0 : index
    %205 = vector.load %arg4[%c0_50, %c0_51] : memref<128x384xbf16, #tpu.memory_space<vmem>>, vector<128x384xbf16>
    %cst_52 = arith.constant dense<0.000000e+00> : vector<1x384xf32>
    %206 = tpu.matmul %204, %205, %cst_52 {dimension_numbers = #tpu.dot_dimension_numbers<[1], [0], [0], [1], [0, 0, 1, 1], [], []>} : vector<1x128xbf16>, vector<128x384xbf16>, vector<1x384xf32> -> vector<1x384xf32>
    %207 = vector.extract_strided_slice %203 {offsets = [0, 0], sizes = [1, 128], strides = [1, 1]} : vector<1x384xf32> to vector<1x128xf32>
    %208 = vector.extract_strided_slice %206 {offsets = [0, 0], sizes = [1, 128], strides = [1, 1]} : vector<1x384xf32> to vector<1x128xf32>
    %209 = arith.addf %207, %208 : vector<1x128xf32>
    %210 = arith.negf %209 : vector<1x128xf32>
    %211 = math.exp %210 : vector<1x128xf32>
    %cst_53 = arith.constant 1.000000e+00 : f32
    %212 = vector.broadcast %cst_53 : f32 to vector<1x128xf32>
    %213 = arith.addf %212, %211 : vector<1x128xf32>
    %214 = arith.divf %212, %213 : vector<1x128xf32>
    %215 = vector.extract_strided_slice %203 {offsets = [0, 128], sizes = [1, 128], strides = [1, 1]} : vector<1x384xf32> to vector<1x128xf32>
    %216 = vector.extract_strided_slice %206 {offsets = [0, 128], sizes = [1, 128], strides = [1, 1]} : vector<1x384xf32> to vector<1x128xf32>
    %217 = arith.addf %215, %216 : vector<1x128xf32>
    %218 = arith.negf %217 : vector<1x128xf32>
    %219 = math.exp %218 : vector<1x128xf32>
    %cst_54 = arith.constant 1.000000e+00 : f32
    %220 = vector.broadcast %cst_54 : f32 to vector<1x128xf32>
    %221 = arith.addf %220, %219 : vector<1x128xf32>
    %222 = arith.divf %220, %221 : vector<1x128xf32>
    %223 = vector.extract_strided_slice %203 {offsets = [0, 256], sizes = [1, 128], strides = [1, 1]} : vector<1x384xf32> to vector<1x128xf32>
    %224 = vector.extract_strided_slice %206 {offsets = [0, 256], sizes = [1, 128], strides = [1, 1]} : vector<1x384xf32> to vector<1x128xf32>
    %225 = arith.addf %224, %11 : vector<1x128xf32>
    %226 = arith.mulf %214, %225 : vector<1x128xf32>
    %227 = arith.addf %223, %226 : vector<1x128xf32>
    %228 = math.tanh %227 : vector<1x128xf32>
    %cst_55 = arith.constant 1.000000e+00 : f32
    %229 = vector.broadcast %cst_55 : f32 to vector<1x128xf32>
    %230 = arith.subf %229, %222 : vector<1x128xf32>
    %231 = arith.mulf %230, %228 : vector<1x128xf32>
    %232 = arith.mulf %222, %202 : vector<1x128xf32>
    %233 = arith.addf %231, %232 : vector<1x128xf32>
    %234 = vector.extract_strided_slice %16 {offsets = [7, 0], sizes = [1, 384], strides = [1, 1]} : vector<8x384xf32> to vector<1x384xf32>
    %235 = arith.truncf %233 : vector<1x128xf32> to vector<1x128xbf16>
    %c0_56 = arith.constant 0 : index
    %c0_57 = arith.constant 0 : index
    %236 = vector.load %arg4[%c0_56, %c0_57] : memref<128x384xbf16, #tpu.memory_space<vmem>>, vector<128x384xbf16>
    %cst_58 = arith.constant dense<0.000000e+00> : vector<1x384xf32>
    %237 = tpu.matmul %235, %236, %cst_58 {dimension_numbers = #tpu.dot_dimension_numbers<[1], [0], [0], [1], [0, 0, 1, 1], [], []>} : vector<1x128xbf16>, vector<128x384xbf16>, vector<1x384xf32> -> vector<1x384xf32>
    %238 = vector.extract_strided_slice %234 {offsets = [0, 0], sizes = [1, 128], strides = [1, 1]} : vector<1x384xf32> to vector<1x128xf32>
    %239 = vector.extract_strided_slice %237 {offsets = [0, 0], sizes = [1, 128], strides = [1, 1]} : vector<1x384xf32> to vector<1x128xf32>
    %240 = arith.addf %238, %239 : vector<1x128xf32>
    %241 = arith.negf %240 : vector<1x128xf32>
    %242 = math.exp %241 : vector<1x128xf32>
    %cst_59 = arith.constant 1.000000e+00 : f32
    %243 = vector.broadcast %cst_59 : f32 to vector<1x128xf32>
    %244 = arith.addf %243, %242 : vector<1x128xf32>
    %245 = arith.divf %243, %244 : vector<1x128xf32>
    %246 = vector.extract_strided_slice %234 {offsets = [0, 128], sizes = [1, 128], strides = [1, 1]} : vector<1x384xf32> to vector<1x128xf32>
    %247 = vector.extract_strided_slice %237 {offsets = [0, 128], sizes = [1, 128], strides = [1, 1]} : vector<1x384xf32> to vector<1x128xf32>
    %248 = arith.addf %246, %247 : vector<1x128xf32>
    %249 = arith.negf %248 : vector<1x128xf32>
    %250 = math.exp %249 : vector<1x128xf32>
    %cst_60 = arith.constant 1.000000e+00 : f32
    %251 = vector.broadcast %cst_60 : f32 to vector<1x128xf32>
    %252 = arith.addf %251, %250 : vector<1x128xf32>
    %253 = arith.divf %251, %252 : vector<1x128xf32>
    %254 = vector.extract_strided_slice %234 {offsets = [0, 256], sizes = [1, 128], strides = [1, 1]} : vector<1x384xf32> to vector<1x128xf32>
    %255 = vector.extract_strided_slice %237 {offsets = [0, 256], sizes = [1, 128], strides = [1, 1]} : vector<1x384xf32> to vector<1x128xf32>
    %256 = arith.addf %255, %11 : vector<1x128xf32>
    %257 = arith.mulf %245, %256 : vector<1x128xf32>
    %258 = arith.addf %254, %257 : vector<1x128xf32>
    %259 = math.tanh %258 : vector<1x128xf32>
    %cst_61 = arith.constant 1.000000e+00 : f32
    %260 = vector.broadcast %cst_61 : f32 to vector<1x128xf32>
    %261 = arith.subf %260, %253 : vector<1x128xf32>
    %262 = arith.mulf %261, %259 : vector<1x128xf32>
    %263 = arith.mulf %253, %233 : vector<1x128xf32>
    %264 = arith.addf %262, %263 : vector<1x128xf32>
    %265 = tpu.concatenate %47, %78, %109, %140, %171, %202, %233, %264 in 0 : vector<1x128xf32>, vector<1x128xf32>, vector<1x128xf32>, vector<1x128xf32>, vector<1x128xf32>, vector<1x128xf32>, vector<1x128xf32>, vector<1x128xf32> -> vector<8x128xf32>
    %266 = arith.index_cast %14 : i32 to index
    %c0_62 = arith.constant 0 : index
    %267 = vector.load %arg12[%266, %c0_62] : memref<8x128xf32, #tpu.memory_space<vmem>>, vector<8x128xf32>
    tpu.vector_store %arg12[%266, %c0_62], %265 {strides = array<i32>} : memref<8x128xf32, #tpu.memory_space<vmem>>, vector<8x128xf32>,
    %c1_i32 = arith.constant 1 : i32
    %c0_63 = arith.constant 0 : index
    %c0_64 = arith.constant 0 : index
    %268 = vector.load %arg13[%c0_63, %c0_64] : memref<1x128xf32, #tpu.memory_space<vmem>>, vector<1x128xf32>
    tpu.vector_store %arg13[%c0_63, %c0_64], %264 {strides = array<i32>} : memref<1x128xf32, #tpu.memory_space<vmem>>, vector<1x128xf32>,
    %c0_65 = arith.constant 0 : index
    %c0_66 = arith.constant 0 : index
    %269 = vector.load %arg12[%c0_65, %c0_66] : memref<8x128xf32, #tpu.memory_space<vmem>>, vector<8x128xf32>
    %270 = arith.truncf %269 : vector<8x128xf32> to vector<8x128xbf16>
    %c0_67 = arith.constant 0 : index
    %c0_68 = arith.constant 0 : index
    %271 = vector.load %arg7[%c0_67, %c0_68] : memref<128x128xbf16, #tpu.memory_space<vmem>>, vector<128x128xbf16>
    %cst_69 = arith.constant dense<0.000000e+00> : vector<8x128xf32>
    %272 = tpu.matmul %270, %271, %cst_69 {dimension_numbers = #tpu.dot_dimension_numbers<[1], [0], [0], [1], [0, 0, 1, 1], [], []>} : vector<8x128xbf16>, vector<128x128xbf16>, vector<8x128xf32> -> vector<8x128xf32>
    %c0_70 = arith.constant 0 : index
    %c0_71 = arith.constant 0 : index
    %273 = vector.load %arg8[%c0_70, %c0_71] : memref<1x128xf32, #tpu.memory_space<vmem>>, vector<1x128xf32>
    %274 = vector.broadcast %273 : vector<1x128xf32> to vector<8x128xf32>
    %275 = arith.addf %272, %274 : vector<8x128xf32>
    %c0_72 = arith.constant 0 : index
    %c0_73 = arith.constant 0 : index
    %276 = vector.load %arg9[%c0_72, %c0_73] : memref<8x128xf32, #tpu.memory_space<vmem>>, vector<8x128xf32>
    tpu.vector_store %arg9[%c0_72, %c0_73], %275 {strides = array<i32>} : memref<8x128xf32, #tpu.memory_space<vmem>>, vector<8x128xf32>,
    %c0_i32_74 = arith.constant 0 : i32
    %277 = arith.cmpi eq, %arg0, %c0_i32_74 : i32
    %278 = arith.extui %277 : i1 to i32
    %c0_i32_75 = arith.constant 0 : i32
    %279 = arith.cmpi ne, %278, %c0_i32_75 : i32
    scf.if %279 {
      %c7 = arith.constant 7 : index
      %c0_76 = arith.constant 0 : index
      %280 = vector.load %arg12[%c7, %c0_76] : memref<8x128xf32, #tpu.memory_space<vmem>>, vector<1x128xf32>
      %c0_77 = arith.constant 0 : index
      %c0_78 = arith.constant 0 : index
      %281 = vector.load %arg10[%c0_77, %c0_78] : memref<1x128xf32, #tpu.memory_space<vmem>>, vector<1x128xf32>
      tpu.vector_store %arg10[%c0_77, %c0_78], %280 {strides = array<i32>} : memref<1x128xf32, #tpu.memory_space<vmem>>, vector<1x128xf32>,
    } else {
    }
    return
  }
  func.func @transform_0(%arg0: i32) -> (i32, i32) {
    %c0_i32 = arith.constant 0 : i32
    %c0_i32_0 = arith.constant 0 : i32
    return %arg0, %c0_i32 : i32, i32
  }
  func.func @transform_1(%arg0: i32) -> (i32, i32) {
    %c0_i32 = arith.constant 0 : i32
    %c0_i32_0 = arith.constant 0 : i32
    %c0_i32_1 = arith.constant 0 : i32
    return %c0_i32, %c0_i32_0 : i32, i32
  }
  func.func @transform_2(%arg0: i32) -> (i32, i32) {
    %c0_i32 = arith.constant 0 : i32
    %c0_i32_0 = arith.constant 0 : i32
    %c0_i32_1 = arith.constant 0 : i32
    return %c0_i32, %c0_i32_0 : i32, i32
  }
  func.func @transform_3(%arg0: i32) -> (i32, i32) {
    %c0_i32 = arith.constant 0 : i32
    %c0_i32_0 = arith.constant 0 : i32
    %c0_i32_1 = arith.constant 0 : i32
    return %c0_i32, %c0_i32_0 : i32, i32
  }
  func.func @transform_4(%arg0: i32) -> (i32, i32) {
    %c0_i32 = arith.constant 0 : i32
    %c0_i32_0 = arith.constant 0 : i32
    %c0_i32_1 = arith.constant 0 : i32
    return %c0_i32, %c0_i32_0 : i32, i32
  }
  func.func @transform_5(%arg0: i32) -> (i32, i32) {
    %c0_i32 = arith.constant 0 : i32
    %c0_i32_0 = arith.constant 0 : i32
    %c0_i32_1 = arith.constant 0 : i32
    return %c0_i32, %c0_i32_0 : i32, i32
  }
  func.func @transform_6(%arg0: i32) -> (i32, i32) {
    %c0_i32 = arith.constant 0 : i32
    %c0_i32_0 = arith.constant 0 : i32
    %c0_i32_1 = arith.constant 0 : i32
    return %c0_i32, %c0_i32_0 : i32, i32
  }
  func.func @transform_7(%arg0: i32) -> (i32, i32) {
    %c0_i32 = arith.constant 0 : i32
    %c0_i32_0 = arith.constant 0 : i32
    %c0_i32_1 = arith.constant 0 : i32
    return %c0_i32, %c0_i32_0 : i32, i32
  }
  func.func @transform_8(%arg0: i32) -> (i32, i32) {
    %c0_i32 = arith.constant 0 : i32
    %c0_i32_0 = arith.constant 0 : i32
    return %arg0, %c0_i32 : i32, i32
  }
  func.func @transform_9(%arg0: i32) -> (i32, i32) {
    %c0_i32 = arith.constant 0 : i32
    %c0_i32_0 = arith.constant 0 : i32
    %c0_i32_1 = arith.constant 0 : i32
    return %c0_i32, %c0_i32_0 : i32, i32
  }
}

</mosaic_0001>

<bundles_post_ra>
// kernel: tpu_custom_call.1
= control target key start
LH: loop header
LB: loop body
LE: loop exit
PB: predicated region body
PF: predicated region fallthrough
CT: control target
= control target key end

     0   :  { %15 = vsyncpa [#allocation6], 0  ;;  %s2703_s0 = inlined_call_operand.hbm [shape: f32[8,16], index: 0, kind: input, shape index: {}]   ;;  %s2704_s1 = inlined_call_operand.vmem [shape: f32[1,128], index: 1, kind: input, shape index: {}]   ;;  %s2705_s2 = inlined_call_operand.hbm [shape: bf16[16,384], index: 2, kind: input, shape index: {}]   ;;  %s2706_s3 = inlined_call_operand.hbm [shape: bf16[128,384], index: 3, kind: input, shape index: {}]   ;;  %s2707_s4 = inlined_call_operand.vmem [shape: f32[1,384], index: 4, kind: input, shape index: {}]   ;;  %s2708_s5 = inlined_call_operand.vmem [shape: f32[1,128], index: 5, kind: input, shape index: {}]   ;;  %s2709_s6 = inlined_call_operand.hbm [shape: bf16[128,128], index: 6, kind: input, shape index: {}]   ;;  %s2710_s7 = inlined_call_operand.vmem [shape: f32[1,128], index: 7, kind: input, shape index: {}]   ;;  %s2711_s8 = inlined_call_operand.hbm [shape: f32[8,128], index: 8, kind: output, shape index: {0}]   ;;  %s2712_s9 = inlined_call_operand.hbm [shape: f32[1,128], index: 9, kind: output, shape index: {1}]  }
   0x1   :  { %16 = vsyncpa [#allocation9], 0 }
   0x2   :  { %17 = vsyncpa [#allocation12], 0 }
   0x3   :  { %18 = vsyncpa [#allocation7], 0 }
   0x4   :  { %19 = vsyncpa [#allocation15], 0  ;;  %s2115_s30 = smov [#allocation8]   ;;  %s1973_s13 = scalar_lea.hbm %s2705_s2, 384 }
   0x5   :  { %s37_s10 = sshll.u32 %s2115_s30, 4  ;;  %p1974_p0 = scmp.ne.s32.totalorder %s2705_s2, %s1973_s13  ;;  %s38_s10 = int_to_ptr.vmem [resolvable:$true] %s37_s10 }
   0x6   :  { %p1977_p1 = scmp.lt.u32.totalorder %s1973_s13, %s2705_s2 }
   0x8   :  { %p1979_p2 = pnand %p1977_p1, %p1974_p0 }
   0xa   :  { %1982 = shalt.err (!%p1979_p2)
}
   0xb   :  { %s1983_s18 = scalar_lea.vmem %s38_s10, 384  ;;  %p1988_p4 = scmp.lt.s32.totalorder %s38_s10, %s38_s10 }
   0xc   :  { %p1984_p3 = scmp.ne.s32.totalorder %s38_s10, %s1983_s18  ;;  %p1989_p5 = scmp.lt.s32.totalorder %s1983_s18, %s1983_s18 }
   0xe   :  { %p1990_p6 = por %p1989_p5, %p1988_p4 }
  0x10   :  { %p1991_p7 = pnand %p1990_p6, %p1984_p3 }
  0x12   :  { %1994 = shalt.err (!%p1991_p7)
}
  0x13   :  { %s2116_s19 = smov 192   ;;  %s2117_s20 = smov 12  }
  0x14   :  { %43 = dma.hbm_to_vmem [thread:$0]  %s2705_s2, 384, %s38_s10, [#allocation9], %s2116_s19, %s2116_s19, %s2117_s20  }
  0x15   :  { %s2118_s23 = smov [#allocation5]   ;;  %s2119_s25 = smov [#allocation10]  }
  0x16   :  { %s26_s24 = sshll.u32 %s2118_s23, 4  ;;  %s49_s26 = sshll.u32 %s2119_s25, 4  ;;  %s27_s24 = int_to_ptr.vmem [resolvable:$true] %s26_s24  ;;  %s50_s26 = int_to_ptr.vmem [resolvable:$true] %s49_s26 }
  0x17   :  { %s1995_s29 = scalar_lea.hbm %s2703_s0, 128 }
  0x18   :  { %p1996_p8 = scmp.ne.s32.totalorder %s2703_s0, %s1995_s29  ;;  %p1999_p9 = scmp.lt.u32.totalorder %s1995_s29, %s2703_s0 }
  0x1a   :  { %p2001_p10 = pnand %p1999_p9, %p1996_p8 }
  0x1c   :  { %2004 = shalt.err (!%p2001_p10)
}
  0x1d   :  { %s2005_s2 = scalar_lea.vmem %s27_s24, 128  ;;  %p2010_p12 = scmp.lt.s32.totalorder %s27_s24, %s27_s24 }
  0x1e   :  { %p2006_p11 = scmp.ne.s32.totalorder %s27_s24, %s2005_s2  ;;  %p2011_p13 = scmp.lt.s32.totalorder %s2005_s2, %s2005_s2 }
  0x20   :  { %p2012_p0 = por %p2011_p13, %p2010_p12 }
  0x22   :  { %p2013_p1 = pnand %p2012_p0, %p2006_p11 }
  0x24   :  { %2016 = shalt.err (!%p2013_p1)
}
  0x25   :  { %29 = dma.hbm_to_vmem [thread:$0]  %s2703_s0, 128, %s27_s24, [#allocation6]  }
  0x26   :  { %s2017_s17 = scalar_lea.hbm %s2706_s3, 3072 }
  0x27   :  { %p2018_p2 = scmp.ne.s32.totalorder %s2706_s3, %s2017_s17  ;;  %p2021_p3 = scmp.lt.u32.totalorder %s2017_s17, %s2706_s3 }
  0x29   :  { %p2023_p4 = pnand %p2021_p3, %p2018_p2 }
  0x2b   :  { %2026 = shalt.err (!%p2023_p4)
}
  0x2c   :  { %s2027_s25 = scalar_lea.vmem %s50_s26, 3072  ;;  %p2032_p6 = scmp.lt.s32.totalorder %s50_s26, %s50_s26 }
  0x2d   :  { %p2028_p5 = scmp.ne.s32.totalorder %s50_s26, %s2027_s25  ;;  %p2033_p7 = scmp.lt.s32.totalorder %s2027_s25, %s2027_s25 }
  0x2f   :  { %p2034_p8 = por %p2033_p7, %p2032_p6 }
  0x31   :  { %p2035_p9 = pnand %p2034_p8, %p2028_p5 }
  0x33   :  { %2038 = shalt.err (!%p2035_p9)
}
  0x34   :  { %55 = dma.hbm_to_vmem [thread:$0]  %s2706_s3, 3072, %s50_s26, [#allocation9], %s2116_s19, %s2116_s19, %s2117_s20  }
  0x35   :  { %s2120_s27 = smov [#allocation11]   ;;  %s2039_s11 = scalar_lea.hbm %s2709_s6, 1024 }
  0x36   :  { %s65_s28 = sshll.u32 %s2120_s27, 4  ;;  %p2040_p10 = scmp.ne.s32.totalorder %s2709_s6, %s2039_s11  ;;  %s66_s28 = int_to_ptr.vmem [resolvable:$true] %s65_s28 }
  0x37   :  { %p2043_p11 = scmp.lt.u32.totalorder %s2039_s11, %s2709_s6 }
  0x39   :  { %p2045_p12 = pnand %p2043_p11, %p2040_p10 }
  0x3b   :  { %2048 = shalt.err (!%p2045_p12)
}
  0x3c   :  { %s2049_s14 = scalar_lea.vmem %s66_s28, 1024  ;;  %p2054_p0 = scmp.lt.s32.totalorder %s66_s28, %s66_s28 }
  0x3d   :  { %p2050_p13 = scmp.ne.s32.totalorder %s66_s28, %s2049_s14  ;;  %p2055_p1 = scmp.lt.s32.totalorder %s2049_s14, %s2049_s14 }
  0x3f   :  { %p2056_p2 = por %p2055_p1, %p2054_p0 }
  0x41   :  { %p2057_p3 = pnand %p2056_p2, %p2050_p13 }
  0x43   :  { %2060 = shalt.err (!%p2057_p3)
}
  0x44   :  { %s2121_s3 = smov 64   ;;  %s2122_s19 = smov 4  }
  0x45   :  { %71 = dma.hbm_to_vmem [thread:$0]  %s2709_s6, 1024, %s66_s28, [#allocation12], %s2121_s3, %s2121_s3, %s2122_s19  }
  0x46   :  { %2105 = dma.done.wait [#allocation6], 128  }
  0x47   :  { %2106 = vsyncadd [#allocation6], 4294967168 }
  0x48   :  { %2107 = dma.done.wait [#allocation9], 3456  }
  0x49   :  { %2108 = vsyncadd [#allocation9], 4294963840 }
  0x4a   :  { %2109 = dma.done.wait [#allocation12], 1024  }
  0x4b   :  { %2110 = vsyncadd [#allocation12], 4294966272  ;;  %v2123_v0 = vmov 0   ;;  %v2234_v1 = vld [vmem:[#allocation10 + $0x4] ss:$12 sps:$4 sm:$0xff]   ;;  %vm132_vm0 = vcmask 130048   ;;  %v101_v38 = vlaneseq }
  0x4c   :  { %168 = vmatprep.mubr.bf16.mxu1 %v2123_v0  ;;  %421 = vmatprep.mubr.bf16.mxu0 %v2123_v0  ;;  %v2236_v2 = vld [vmem:[#allocation10] ss:$12 sps:$4 sm:$0xff]   ;;  %v2239_v3 = vld [vmem:[#allocation10 + $0x1c] ss:$12 sps:$4 sm:$0xff]   ;;  %v2242_v4 = vld [vmem:[#allocation10 + $0x18] ss:$12 sps:$4 sm:$0xff]  }
  0x4d   :  { %389 = vmatprep.subr.bf16.mxu0 %v2234_v1  ;;  %v2244_v5 = vld [vmem:[#allocation10 + $0x34] ss:$12 sps:$4 sm:$0xff]   ;;  %v1838_v6 = vld [vmem:[#allocation8 + $0x4] ss:$12 sps:$4 sm:$0xff]   ;;  %v2248_v9 = vld [vmem:[#allocation10 + $0x30] ss:$12 sps:$4 sm:$0xff]  }
  0x4e   :  { %390 = vmatpush1.bf16.msra.mxu0 %v2236_v2  ;;  %136 = vmatprep.subr.bf16.mxu1 %v1838_v6  ;;  %v1842_v7 = vld [vmem:[#allocation8] ss:$12 sps:$4 sm:$0xff]   ;;  %v93_v8 = vld [vmem:[#allocation5] sm:$0xff]  ;;  %v2251_v11 = vld [vmem:[#allocation10 + $0x4c] ss:$12 sps:$4 sm:$0xff]   ;;  %v2124_v12 = vmov 0.0  }
  0x4f   :  { %391 = vmatprep.subr.bf16.mxu0 %v2239_v3  ;;  %v94_v10 = vpack.c.bf16 %v93_v8, %v93_v8  ;;  %137 = vmatpush1.bf16.msra.mxu1 %v1842_v7  ;;  %v1847_v13 = vld [vmem:[#allocation8 + $0x8] ss:$12 sps:$4 sm:$0xff]   ;;  %v2255_v14 = vld [vmem:[#allocation10 + $0x48] ss:$12 sps:$4 sm:$0xff]   ;;  %vm2125_vm1 = vmmov 0   ;;  %v102_v41 = vshrl.u32 %v101_v38, 7 }
  0x50   :  { %1630 = vmatprep.subr.bf16.mxu1 %v2124_v12  ;;  %v2259_v15 = vld [vmem:[#allocation10 + $0x64] ss:$12 sps:$4 sm:$0xff]   ;;  %v2264_v16 = vld [vmem:[#allocation10 + $0x60] ss:$12 sps:$4 sm:$0xff]   ;;  %v2267_v17 = vld [vmem:[#allocation10 + $0x7c] ss:$12 sps:$4 sm:$0xff]  }
  0x51   :  { %v91_v18 = vld [vmem:[%s2704_s1] sm:$0x1]  ;;  %v2275_v20 = vld [vmem:[#allocation10 + $0x78] ss:$12 sps:$4 sm:$0xff]   ;;  %v2283_v22 = vld [vmem:[#allocation10 + $0x20] ss:$12 sps:$4 sm:$0xff]  }
  0x52   :  { %392 = vmatpush1.bf16.msra.mxu0 %v2242_v4  ;;  %1496 = vmatmul.mubr.msk.bf16.vlgmr.msra.gmra.mrb[0].mxu1 %vm132_vm0, %v94_v10  ;;  %v2273_v19 = vld [vmem:[#allocation10 + $0x8] ss:$12 sps:$4 sm:$0xff]   ;;  %92 = vst [vmem:[#allocation4] sm:$0x1] %v91_v18  ;;  %v2285_v23 = vld [vmem:[#allocation10 + $0x90] ss:$12 sps:$4 sm:$0xff]  }
  0x53   :  { %393 = vmatprep.subr.bf16.mxu0 %v2244_v5  ;;  %1631 = vmatpush3.bf16.msra.mxu1 %v1847_v13  ;;  %v2279_v21 = vld [vmem:[#allocation10 + $0x94] ss:$12 sps:$4 sm:$0xff]   ;;  %v2290_v24 = vld [vmem:[#allocation10 + $0xac] ss:$12 sps:$4 sm:$0xff]   ;;  %v2305_v28 = vld [vmem:[#allocation10 + $0x50] ss:$12 sps:$4 sm:$0xff]  }
  0x54   :  { %1632 = vmatprep.mubr.msk.bf16.mxu1 %vm2125_vm1, %v2124_v12  ;;  %1636 = vmatprep.subr.bf16.mxu1 %v2124_v12  ;;  %v2293_v25 = vld [vmem:[#allocation10 + $0x38] ss:$12 sps:$4 sm:$0xff]   ;;  %v2297_v26 = vld [vmem:[#allocation10 + $0xa8] ss:$12 sps:$4 sm:$0xff]   ;;  %v2319_v31 = vld [vmem:[#allocation10 + $0x80] ss:$12 sps:$4 sm:$0xff]  }
  0x55   :  { %v2312_v30 = vld [vmem:[#allocation10 + $0x68] ss:$12 sps:$4 sm:$0xff]   ;;  %v2325_v32 = vld [vmem:[#allocation10 + $0x98] ss:$12 sps:$4 sm:$0xff]   ;;  %v2331_v33 = vld [vmem:[#allocation10 + $0xb0] ss:$12 sps:$4 sm:$0xff]  }
  0x56   :  { %394 = vmatpush1.bf16.msra.mxu0 %v2248_v9  ;;  %v103_v44 = vsub.s32 0, %v102_v41  ;;  %v99_v45 = vld [vmem:[%s2707_s4] sm:$0x7]  ;;  %v107_v46 = vsub.s32 1, %v102_v41  ;;  %v111_v7 = vsub.s32 2, %v102_v41  ;;  %vm1327_vm2 = vcmask 1040384  }
  0x57   :  { %395 = vmatprep.subr.bf16.mxu0 %v2251_v11  ;;  %vm1329_vm3 = vcmask 1041408   ;;  %vm1331_vm4 = vcmask 1042432   ;;  %vm1333_vm5 = vcmask 1043456   ;;  %vm1335_vm6 = vcmask 1044480  }
  0x58   :  { %v104_v47 = vrot.slane %v99_v45, %v103_v44  ;;  %v108_v48 = vrot.slane %v99_v45, %v107_v46  ;;  %v112_v13 = vrot.slane %v99_v45, %v111_v7  ;;  %vm1337_vm7 = vcmask 1045504  }
  0x59   :  { %v2301_v27 = vld [vmem:[#allocation4] sm:$0x1]  ;;  %vm1339_vm8 = vcmask 1046528  }
  0x5a   :  { %396 = vmatpush1.bf16.msra.mxu0 %v2255_v14  ;;  %1633 = vmatmul.mubr.msk.bf16.vlgmr.msra.gmra.mrb[4].mxu1 %vm132_vm0, %v94_v10  ;;  %v228_v29 = vpack.c.bf16 %v2301_v27, %v2301_v27  ;;  %v2377_v10 = vld [vmem:[%s2708_s5] sm:$0x1] }
  0x5b   :  { %397 = vmatprep.subr.bf16.mxu0 %v2259_v15  ;;  %1637 = vmatpush3.bf16.msra.mxu1 %v2273_v19 }
  0x5c   :  { %1638 = vmatprep.subr.bf16.mxu1 %v2124_v12  ;;  %1652 = vmatprep.mubr.msk.bf16.mxu1 %vm2125_vm1, %v2124_v12 }
  0x5e   :  { %398 = vmatpush1.bf16.msra.mxu0 %v2264_v16 }
  0x5f   :  { %399 = vmatprep.subr.bf16.mxu0 %v2267_v17  ;;  %1639 = vmatpush3.bf16.msra.mxu1 %v2283_v22 }
  0x60   :  { %1640 = vmatprep.subr.bf16.mxu1 %v2124_v12 }
  0x62   :  { %400 = vmatpush1.bf16.msra.mxu0 %v2275_v20 }
  0x63   :  { %401 = vmatprep.subr.bf16.mxu0 %v2279_v21  ;;  %1641 = vmatpush3.bf16.msra.mxu1 %v2293_v25 }
  0x64   :  { %1642 = vmatprep.subr.bf16.mxu1 %v2124_v12 }
  0x66   :  { %402 = vmatpush1.bf16.msra.mxu0 %v2285_v23 }
  0x67   :  { %403 = vmatprep.subr.bf16.mxu0 %v2290_v24  ;;  %1643 = vmatpush3.bf16.msra.mxu1 %v2305_v28 }
  0x68   :  { %1644 = vmatprep.subr.bf16.mxu1 %v2124_v12 }
  0x6a   :  { %404 = vmatpush1.bf16.msra.mxu0 %v2297_v26 }
  0x6b   :  { %493 = vmatprep.subr.bf16.mxu0 %v2234_v1  ;;  %1645 = vmatpush3.bf16.msra.mxu1 %v2312_v30 }
  0x6c   :  { %1646 = vmatprep.subr.bf16.mxu1 %v2124_v12 }
  0x6d   :  { %422 = vmatmul.mubr.bf16.vlgmr.msra.gmra.mrb[0].mxu0 %v228_v29 }
  0x6e   :  { %494 = vmatpush1.bf16.msra.mxu0 %v2236_v2  ;;  %525 = vmatprep.mubr.bf16.mxu0 %v2123_v0 }
  0x6f   :  { %495 = vmatprep.subr.bf16.mxu0 %v2239_v3  ;;  %1647 = vmatpush3.bf16.msra.mxu1 %v2319_v31 }
  0x70   :  { %1648 = vmatprep.subr.bf16.mxu1 %v2124_v12 }
  0x72   :  { %496 = vmatpush1.bf16.msra.mxu0 %v2242_v4 }
  0x73   :  { %497 = vmatprep.subr.bf16.mxu0 %v2244_v5  ;;  %1649 = vmatpush3.bf16.msra.mxu1 %v2325_v32 }
  0x74   :  { %1650 = vmatprep.subr.bf16.mxu1 %v2124_v12 }
  0x76   :  { %498 = vmatpush1.bf16.msra.mxu0 %v2248_v9 }
  0x77   :  { %499 = vmatprep.subr.bf16.mxu0 %v2251_v11  ;;  %1651 = vmatpush3.bf16.msra.mxu1 %v2331_v33 }
  0x78   :  { %1656 = vmatprep.subr.bf16.mxu1 %v2124_v12 }
  0x7a   :  { %500 = vmatpush1.bf16.msra.mxu0 %v2255_v14  ;;  %1653 = vmatmul.mubr.bf16.vlgmr.msra.gmra.mrb[8].mxu1 %v228_v29 }
  0x7b   :  { %501 = vmatprep.subr.bf16.mxu0 %v2259_v15  ;;  %1657 = vmatpush3.bf16.msra.mxu1 %v2273_v19 }
  0x7c   :  { %1658 = vmatprep.subr.bf16.mxu1 %v2124_v12  ;;  %1672 = vmatprep.mubr.msk.bf16.mxu1 %vm2125_vm1, %v2124_v12 }
  0x7e   :  { %502 = vmatpush1.bf16.msra.mxu0 %v2264_v16 }
  0x7f   :  { %503 = vmatprep.subr.bf16.mxu0 %v2267_v17  ;;  %1659 = vmatpush3.bf16.msra.mxu1 %v2283_v22 }
  0x80   :  { %1660 = vmatprep.subr.bf16.mxu1 %v2124_v12 }
  0x82   :  { %504 = vmatpush1.bf16.msra.mxu0 %v2275_v20 }
  0x83   :  { %505 = vmatprep.subr.bf16.mxu0 %v2279_v21  ;;  %1661 = vmatpush3.bf16.msra.mxu1 %v2293_v25 }
  0x84   :  { %1662 = vmatprep.subr.bf16.mxu1 %v2124_v12 }
  0x86   :  { %506 = vmatpush1.bf16.msra.mxu0 %v2285_v23 }
  0x87   :  { %507 = vmatprep.subr.bf16.mxu0 %v2290_v24  ;;  %1663 = vmatpush3.bf16.msra.mxu1 %v2305_v28 }
  0x88   :  { %1664 = vmatprep.subr.bf16.mxu1 %v2124_v12 }
  0x8a   :  { %508 = vmatpush1.bf16.msra.mxu0 %v2297_v26 }
  0x8b   :  { %613 = vmatprep.subr.bf16.mxu0 %v2234_v1  ;;  %1665 = vmatpush3.bf16.msra.mxu1 %v2312_v30 }
  0x8c   :  { %1666 = vmatprep.subr.bf16.mxu1 %v2124_v12 }
  0x8f   :  { %1667 = vmatpush3.bf16.msra.mxu1 %v2319_v31 }
  0x90   :  { %1668 = vmatprep.subr.bf16.mxu1 %v2124_v12 }
  0x93   :  { %1669 = vmatpush3.bf16.msra.mxu1 %v2325_v32 }
  0x94   :  { %1670 = vmatprep.subr.bf16.mxu1 %v2124_v12 }
  0x97   :  { %1671 = vmatpush3.bf16.msra.mxu1 %v2331_v33 }
  0x98   :  { %1676 = vmatprep.subr.bf16.mxu1 %v2124_v12 }
 0x125   :  { %v170_v34 = vpop.f32.mrb[0].mxu1 }
 0x126   :  { %v172_v35 = vpop.f32.mrb[1].mxu1  ;;  %v2368_v49 = vadd.f32 %v170_v34, %v104_v47 }
 0x127   :  { %v174_v36 = vpop.f32.mrb[2].mxu1  ;;  %v2371_v53 = vadd.f32 %v172_v35, %v108_v48 }
 0x128   :  { %v175_v37 = vpop.f32.mrb[3].mxu1 }
 0x12d   :  { %v211_v39 = vpop.f32.mrb[4].mxu1 }
 0x12e   :  { %v1634_v40 = vpop.f32.mrb[5].mxu1  ;;  %v2380_v35 = vadd.f32 %v211_v39, %v112_v13 }
 0x12f   :  { %v214_v42 = vpop.f32.mrb[6].mxu1 }
 0x130   :  { %v1635_v43 = vpop.f32.mrb[7].mxu1 }
 0x140   :  { %v423_v50 = vpop.f32.mrb[0].mxu0 }
 0x141   :  { %v470_v51 = vadd.f32 %v423_v50, %v2368_v49  ;;  %v425_v52 = vpop.f32.mrb[1].mxu0 }
 0x142   :  { %v427_v54 = vpop.f32.mrb[2].mxu0  ;;  %v477_v57 = vadd.f32 %v425_v52, %v2371_v53 }
 0x143   :  { %v1522_v55 = vmul.f32 -1.442695, %v470_v51  ;;  %v428_v56 = vpop.f32.mrb[3].mxu0 }
 0x144   :  { %v1523_v58 = vmul.f32 -1.442695, %v477_v57 }
 0x145   :  { %1873 = vpow2.f32 %v1522_v55 }
 0x146   :  { %1875 = vpow2.f32 %v1523_v58 }
 0x14d   :  { %v464_v61 = vpop.f32.mrb[8].mxu1 }
 0x14e   :  { %v1654_v62 = vpop.f32.mrb[9].mxu1  ;;  %v484_v29 = vadd.f32 %v464_v61, %v2377_v10 }
 0x14f   :  { %v1874_v59 = vpop.eup %1873  ;;  %v467_v63 = vpop.f32.mrb[10].mxu1 }
 0x150   :  { %v474_v60 = vadd.f32 1.0, %v1874_v59  ;;  %v1655_v6 = vpop.f32.mrb[11].mxu1  ;;  %v1876_v8 = vpop.eup %1875 }
 0x151   :  { %v481_v18 = vadd.f32 1.0, %v1876_v8 }
 0x152   :  { %1877 = vrcp.f32 %v474_v60 }
 0x153   :  { %1879 = vrcp.f32 %v481_v18 }
 0x15c   :  { %v1878_v34 = vpop.eup %1877 }
 0x15d   :  { %v485_v36 = vmul.f32 %v1878_v34, %v484_v29  ;;  %v1880_v38 = vpop.eup %1879 }
 0x15e   :  { %v488_v40 = vsub.f32 1.0, %v1880_v38  ;;  %v490_v43 = vmul.f32 %v1880_v38, %v2301_v27 }
 0x15f   :  { %v486_v37 = vadd.f32 %v485_v36, %v2380_v35 }
 0x161   :  { %1881 = vtanh.f32 %v486_v37 }
 0x16b   :  { %v1882_v41 = vpop.eup %1881 }
 0x16c   :  { %v489_v42 = vmul.f32 %v1882_v41, %v488_v40 }
 0x16e   :  { %v2384_v44 = vadd.f32 %v490_v43, %v489_v42 }
 0x170   :  { %v492_v45 = vpack.c.bf16 %v2384_v44, %v2384_v44  ;;  %v604_v36 = vrot.slane %v2384_v44, 7 }
 0x172   :  { %526 = vmatmul.mubr.bf16.vlgmr.msra.gmra.mrb[4].mxu0 %v492_v45  ;;  %1673 = vmatmul.mubr.bf16.vlgmr.msra.gmra.mrb[12].mxu1 %v492_v45 }
 0x173   :  { %614 = vmatpush1.bf16.msra.mxu0 %v2236_v2  ;;  %1677 = vmatpush3.bf16.msra.mxu1 %v2273_v19 }
 0x174   :  { %615 = vmatprep.subr.bf16.mxu0 %v2239_v3  ;;  %1678 = vmatprep.subr.bf16.mxu1 %v2124_v12 }
 0x175   :  { %645 = vmatprep.mubr.bf16.mxu0 %v2123_v0  ;;  %1692 = vmatprep.mubr.msk.bf16.mxu1 %vm2125_vm1, %v2124_v12 }
 0x177   :  { %616 = vmatpush1.bf16.msra.mxu0 %v2242_v4  ;;  %1679 = vmatpush3.bf16.msra.mxu1 %v2283_v22 }
 0x178   :  { %617 = vmatprep.subr.bf16.mxu0 %v2244_v5  ;;  %1680 = vmatprep.subr.bf16.mxu1 %v2124_v12 }
 0x17b   :  { %618 = vmatpush1.bf16.msra.mxu0 %v2248_v9  ;;  %1681 = vmatpush3.bf16.msra.mxu1 %v2293_v25 }
 0x17c   :  { %619 = vmatprep.subr.bf16.mxu0 %v2251_v11  ;;  %1682 = vmatprep.subr.bf16.mxu1 %v2124_v12 }
 0x17f   :  { %620 = vmatpush1.bf16.msra.mxu0 %v2255_v14  ;;  %1683 = vmatpush3.bf16.msra.mxu1 %v2305_v28 }
 0x180   :  { %621 = vmatprep.subr.bf16.mxu0 %v2259_v15  ;;  %1684 = vmatprep.subr.bf16.mxu1 %v2124_v12 }
 0x183   :  { %622 = vmatpush1.bf16.msra.mxu0 %v2264_v16  ;;  %1685 = vmatpush3.bf16.msra.mxu1 %v2312_v30 }
 0x184   :  { %623 = vmatprep.subr.bf16.mxu0 %v2267_v17  ;;  %1686 = vmatprep.subr.bf16.mxu1 %v2124_v12 }
 0x187   :  { %624 = vmatpush1.bf16.msra.mxu0 %v2275_v20  ;;  %1687 = vmatpush3.bf16.msra.mxu1 %v2319_v31 }
 0x188   :  { %625 = vmatprep.subr.bf16.mxu0 %v2279_v21  ;;  %1688 = vmatprep.subr.bf16.mxu1 %v2124_v12 }
 0x18b   :  { %626 = vmatpush1.bf16.msra.mxu0 %v2285_v23  ;;  %1689 = vmatpush3.bf16.msra.mxu1 %v2325_v32 }
 0x18c   :  { %627 = vmatprep.subr.bf16.mxu0 %v2290_v24  ;;  %1690 = vmatprep.subr.bf16.mxu1 %v2124_v12 }
 0x18f   :  { %628 = vmatpush1.bf16.msra.mxu0 %v2297_v26  ;;  %1691 = vmatpush3.bf16.msra.mxu1 %v2331_v33 }
 0x190   :  { %732 = vmatprep.subr.bf16.mxu0 %v2234_v1  ;;  %1696 = vmatprep.subr.bf16.mxu1 %v2124_v12 }
 0x245   :  { %v527_v27 = vpop.f32.mrb[4].mxu0  ;;  %v568_v39 = vpop.f32.mrb[12].mxu1 }
 0x246   :  { %v575_v46 = vrot.slane %v527_v27, 7  ;;  %v529_v47 = vpop.f32.mrb[5].mxu0  ;;  %v1674_v48 = vpop.f32.mrb[13].mxu1  ;;  %v594_v63 = vadd.f32 %v568_v39, %v2377_v10 }
 0x247   :  { %v585_v50 = vrot.slane %v529_v47, 7  ;;  %v531_v51 = vpop.f32.mrb[6].mxu0  ;;  %v571_v52 = vpop.f32.mrb[14].mxu1 }
 0x248   :  { %v577_v54 = vadd.f32 %v575_v46, %v2368_v49  ;;  %v532_v55 = vpop.f32.mrb[7].mxu0  ;;  %v1675_v56 = vpop.f32.mrb[15].mxu1  ;;  %v596_v7 = vrot.slane %v594_v63, 7 }
 0x249   :  { %v587_v58 = vadd.f32 %v585_v50, %v2371_v53 }
 0x24a   :  { %v1524_v57 = vmul.f32 -1.442695, %v577_v54 }
 0x24b   :  { %v1525_v59 = vmul.f32 -1.442695, %v587_v58 }
 0x24c   :  { %1883 = vpow2.f32 %v1524_v57 }
 0x24d   :  { %1885 = vpow2.f32 %v1525_v59 }
 0x256   :  { %v1884_v60 = vpop.eup %1883 }
 0x257   :  { %v581_v61 = vadd.f32 1.0, %v1884_v60  ;;  %v1886_v62 = vpop.eup %1885 }
 0x258   :  { %v591_v6 = vadd.f32 1.0, %v1886_v62 }
 0x259   :  { %1887 = vrcp.f32 %v581_v61 }
 0x25a   :  { %1889 = vrcp.f32 %v591_v6 }
 0x263   :  { %v1888_v8 = vpop.eup %1887 }
 0x264   :  { %v598_v13 = vmul.f32 %v1888_v8, %v596_v7  ;;  %v1890_v29 = vpop.eup %1889 }
 0x265   :  { %v601_v34 = vsub.f32 1.0, %v1890_v29  ;;  %v606_v40 = vmul.f32 %v1890_v29, %v604_v36 }
 0x266   :  { %v599_v18 = vadd.f32 %v598_v13, %v2380_v35 }
 0x268   :  { %1891 = vtanh.f32 %v599_v18 }
 0x272   :  { %v1892_v37 = vpop.eup %1891 }
 0x273   :  { %v602_v38 = vmul.f32 %v1892_v37, %v601_v34 }
 0x275   :  { %v2428_v41 = vadd.f32 %v606_v40, %v602_v38 }
 0x277   :  { %v608_v42 = vpack.c.bf16 %v2428_v41, %v2428_v41  ;;  %v724_v8 = vrot.slane %v2428_v41, 7 }
 0x279   :  { %v610_v43 = vshrl.u32 %v608_v42, 16  ;;  %v1328_v42 = vsel %vm1327_vm2, %v2384_v44, %v2428_v41 }
 0x27b   :  { %646 = vmatmul.mubr.bf16.vlgmr.msra.gmra.mrb[8].mxu0 %v610_v43  ;;  %1693 = vmatmul.mubr.bf16.vlgmr.msra.gmra.mrb[16].mxu1 %v610_v43 }
 0x27c   :  { %733 = vmatpush1.bf16.msra.mxu0 %v2236_v2  ;;  %1697 = vmatpush3.bf16.msra.mxu1 %v2273_v19 }
 0x27d   :  { %734 = vmatprep.subr.bf16.mxu0 %v2239_v3  ;;  %1698 = vmatprep.subr.bf16.mxu1 %v2124_v12 }
 0x27e   :  { %764 = vmatprep.mubr.bf16.mxu0 %v2123_v0  ;;  %1712 = vmatprep.mubr.msk.bf16.mxu1 %vm2125_vm1, %v2124_v12 }
 0x280   :  { %735 = vmatpush1.bf16.msra.mxu0 %v2242_v4  ;;  %1699 = vmatpush3.bf16.msra.mxu1 %v2283_v22 }
 0x281   :  { %736 = vmatprep.subr.bf16.mxu0 %v2244_v5  ;;  %1700 = vmatprep.subr.bf16.mxu1 %v2124_v12 }
 0x284   :  { %737 = vmatpush1.bf16.msra.mxu0 %v2248_v9  ;;  %1701 = vmatpush3.bf16.msra.mxu1 %v2293_v25 }
 0x285   :  { %738 = vmatprep.subr.bf16.mxu0 %v2251_v11  ;;  %1702 = vmatprep.subr.bf16.mxu1 %v2124_v12 }
 0x288   :  { %739 = vmatpush1.bf16.msra.mxu0 %v2255_v14  ;;  %1703 = vmatpush3.bf16.msra.mxu1 %v2305_v28 }
 0x289   :  { %740 = vmatprep.subr.bf16.mxu0 %v2259_v15  ;;  %1704 = vmatprep.subr.bf16.mxu1 %v2124_v12 }
 0x28c   :  { %741 = vmatpush1.bf16.msra.mxu0 %v2264_v16  ;;  %1705 = vmatpush3.bf16.msra.mxu1 %v2312_v30 }
 0x28d   :  { %742 = vmatprep.subr.bf16.mxu0 %v2267_v17  ;;  %1706 = vmatprep.subr.bf16.mxu1 %v2124_v12 }
 0x290   :  { %743 = vmatpush1.bf16.msra.mxu0 %v2275_v20  ;;  %1707 = vmatpush3.bf16.msra.mxu1 %v2319_v31 }
 0x291   :  { %744 = vmatprep.subr.bf16.mxu0 %v2279_v21  ;;  %1708 = vmatprep.subr.bf16.mxu1 %v2124_v12 }
 0x294   :  { %745 = vmatpush1.bf16.msra.mxu0 %v2285_v23  ;;  %1709 = vmatpush3.bf16.msra.mxu1 %v2325_v32 }
 0x295   :  { %746 = vmatprep.subr.bf16.mxu0 %v2290_v24  ;;  %1710 = vmatprep.subr.bf16.mxu1 %v2124_v12 }
 0x298   :  { %747 = vmatpush1.bf16.msra.mxu0 %v2297_v26  ;;  %1711 = vmatpush3.bf16.msra.mxu1 %v2331_v33 }
 0x299   :  { %853 = vmatprep.subr.bf16.mxu0 %v2234_v1  ;;  %1716 = vmatprep.subr.bf16.mxu1 %v2124_v12 }
 0x34e   :  { %v647_v45 = vpop.f32.mrb[8].mxu0  ;;  %v688_v27 = vpop.f32.mrb[16].mxu1 }
 0x34f   :  { %v695_v39 = vrot.slane %v647_v45, 6  ;;  %v649_v46 = vpop.f32.mrb[9].mxu0  ;;  %v1694_v47 = vpop.f32.mrb[17].mxu1  ;;  %v714_v63 = vadd.f32 %v688_v27, %v2377_v10 }
 0x350   :  { %v705_v48 = vrot.slane %v649_v46, 6  ;;  %v651_v50 = vpop.f32.mrb[10].mxu0  ;;  %v691_v51 = vpop.f32.mrb[18].mxu1 }
 0x351   :  { %v697_v52 = vadd.f32 %v695_v39, %v2368_v49  ;;  %v652_v54 = vpop.f32.mrb[11].mxu0  ;;  %v1695_v55 = vpop.f32.mrb[19].mxu1  ;;  %v716_v6 = vrot.slane %v714_v63, 6 }
 0x352   :  { %v707_v56 = vadd.f32 %v705_v48, %v2371_v53 }
 0x353   :  { %v1526_v57 = vmul.f32 -1.442695, %v697_v52 }
 0x354   :  { %v1527_v58 = vmul.f32 -1.442695, %v707_v56 }
 0x355   :  { %1893 = vpow2.f32 %v1526_v57 }
 0x356   :  { %1895 = vpow2.f32 %v1527_v58 }
 0x35f   :  { %v1894_v59 = vpop.eup %1893 }
 0x360   :  { %v1896_v60 = vpop.eup %1895  ;;  %v701_v61 = vadd.f32 1.0, %v1894_v59 }
 0x361   :  { %v711_v62 = vadd.f32 1.0, %v1896_v60 }
 0x362   :  { %1897 = vrcp.f32 %v701_v61 }
 0x363   :  { %1899 = vrcp.f32 %v711_v62 }
 0x36c   :  { %v1898_v7 = vpop.eup %1897 }
 0x36d   :  { %v1900_v13 = vpop.eup %1899  ;;  %v718_v18 = vmul.f32 %v1898_v7, %v716_v6 }
 0x36e   :  { %v726_v29 = vmul.f32 %v1900_v13, %v724_v8  ;;  %v721_v36 = vsub.f32 1.0, %v1900_v13 }
 0x36f   :  { %v719_v34 = vadd.f32 %v718_v18, %v2380_v35 }
 0x371   :  { %1901 = vtanh.f32 %v719_v34 }
 0x37b   :  { %v1902_v37 = vpop.eup %1901 }
 0x37c   :  { %v722_v38 = vmul.f32 %v1902_v37, %v721_v36 }
 0x37e   :  { %v2472_v40 = vadd.f32 %v726_v29, %v722_v38 }
 0x380   :  { %v728_v43 = vpack.c.bf16 %v2472_v40, %v2472_v40  ;;  %v2479_v45 = vsel %vm1329_vm3, %v1328_v42, %v2472_v40  ;;  %v843_v8 = vrot.slane %v2472_v40, 7 }
 0x382   :  { %v730_v27 = vrot.slane %v728_v43, 1 }
 0x384   :  { %765 = vmatmul.mubr.bf16.vlgmr.msra.gmra.mrb[12].mxu0 %v730_v27  ;;  %1713 = vmatmul.mubr.bf16.vlgmr.msra.gmra.mrb[20].mxu1 %v730_v27 }
 0x385   :  { %854 = vmatpush1.bf16.msra.mxu0 %v2236_v2  ;;  %1717 = vmatpush3.bf16.msra.mxu1 %v2273_v19 }
 0x386   :  { %855 = vmatprep.subr.bf16.mxu0 %v2239_v3  ;;  %1718 = vmatprep.subr.bf16.mxu1 %v2124_v12 }
 0x387   :  { %885 = vmatprep.mubr.bf16.mxu0 %v2123_v0  ;;  %1732 = vmatprep.mubr.msk.bf16.mxu1 %vm2125_vm1, %v2124_v12 }
 0x389   :  { %856 = vmatpush1.bf16.msra.mxu0 %v2242_v4  ;;  %1719 = vmatpush3.bf16.msra.mxu1 %v2283_v22 }
 0x38a   :  { %857 = vmatprep.subr.bf16.mxu0 %v2244_v5  ;;  %1720 = vmatprep.subr.bf16.mxu1 %v2124_v12 }
 0x38d   :  { %858 = vmatpush1.bf16.msra.mxu0 %v2248_v9  ;;  %1721 = vmatpush3.bf16.msra.mxu1 %v2293_v25 }
 0x38e   :  { %859 = vmatprep.subr.bf16.mxu0 %v2251_v11  ;;  %1722 = vmatprep.subr.bf16.mxu1 %v2124_v12 }
 0x391   :  { %860 = vmatpush1.bf16.msra.mxu0 %v2255_v14  ;;  %1723 = vmatpush3.bf16.msra.mxu1 %v2305_v28 }
 0x392   :  { %861 = vmatprep.subr.bf16.mxu0 %v2259_v15  ;;  %1724 = vmatprep.subr.bf16.mxu1 %v2124_v12 }
 0x395   :  { %862 = vmatpush1.bf16.msra.mxu0 %v2264_v16  ;;  %1725 = vmatpush3.bf16.msra.mxu1 %v2312_v30 }
 0x396   :  { %863 = vmatprep.subr.bf16.mxu0 %v2267_v17  ;;  %1726 = vmatprep.subr.bf16.mxu1 %v2124_v12 }
 0x399   :  { %864 = vmatpush1.bf16.msra.mxu0 %v2275_v20  ;;  %1727 = vmatpush3.bf16.msra.mxu1 %v2319_v31 }
 0x39a   :  { %865 = vmatprep.subr.bf16.mxu0 %v2279_v21  ;;  %1728 = vmatprep.subr.bf16.mxu1 %v2124_v12 }
 0x39d   :  { %866 = vmatpush1.bf16.msra.mxu0 %v2285_v23  ;;  %1729 = vmatpush3.bf16.msra.mxu1 %v2325_v32 }
 0x39e   :  { %867 = vmatprep.subr.bf16.mxu0 %v2290_v24  ;;  %1730 = vmatprep.subr.bf16.mxu1 %v2124_v12 }
 0x3a1   :  { %868 = vmatpush1.bf16.msra.mxu0 %v2297_v26  ;;  %1731 = vmatpush3.bf16.msra.mxu1 %v2331_v33 }
 0x3a2   :  { %972 = vmatprep.subr.bf16.mxu0 %v2234_v1  ;;  %1736 = vmatprep.subr.bf16.mxu1 %v2124_v12 }
 0x457   :  { %v766_v44 = vpop.f32.mrb[12].mxu0  ;;  %v807_v41 = vpop.f32.mrb[20].mxu1 }
 0x458   :  { %v814_v39 = vrot.slane %v766_v44, 5  ;;  %v768_v46 = vpop.f32.mrb[13].mxu0  ;;  %v1714_v47 = vpop.f32.mrb[21].mxu1  ;;  %v833_v63 = vadd.f32 %v807_v41, %v2377_v10 }
 0x459   :  { %v824_v48 = vrot.slane %v768_v46, 5  ;;  %v770_v50 = vpop.f32.mrb[14].mxu0  ;;  %v810_v51 = vpop.f32.mrb[22].mxu1 }
 0x45a   :  { %v816_v52 = vadd.f32 %v814_v39, %v2368_v49  ;;  %v771_v54 = vpop.f32.mrb[15].mxu0  ;;  %v1715_v55 = vpop.f32.mrb[23].mxu1  ;;  %v835_v6 = vrot.slane %v833_v63, 5 }
 0x45b   :  { %v826_v56 = vadd.f32 %v824_v48, %v2371_v53 }
 0x45c   :  { %v1528_v57 = vmul.f32 -1.442695, %v816_v52 }
 0x45d   :  { %v1529_v58 = vmul.f32 -1.442695, %v826_v56 }
 0x45e   :  { %1903 = vpow2.f32 %v1528_v57 }
 0x45f   :  { %1905 = vpow2.f32 %v1529_v58 }
 0x468   :  { %v1904_v59 = vpop.eup %1903 }
 0x469   :  { %v1906_v60 = vpop.eup %1905  ;;  %v820_v61 = vadd.f32 1.0, %v1904_v59 }
 0x46a   :  { %v830_v62 = vadd.f32 1.0, %v1906_v60 }
 0x46b   :  { %1907 = vrcp.f32 %v820_v61 }
 0x46c   :  { %1909 = vrcp.f32 %v830_v62 }
 0x475   :  { %v1908_v7 = vpop.eup %1907 }
 0x476   :  { %v1910_v13 = vpop.eup %1909  ;;  %v837_v18 = vmul.f32 %v1908_v7, %v835_v6 }
 0x477   :  { %v845_v29 = vmul.f32 %v1910_v13, %v843_v8  ;;  %v840_v36 = vsub.f32 1.0, %v1910_v13 }
 0x478   :  { %v838_v34 = vadd.f32 %v837_v18, %v2380_v35 }
 0x47a   :  { %1911 = vtanh.f32 %v838_v34 }
 0x484   :  { %v1912_v37 = vpop.eup %1911 }
 0x485   :  { %v841_v38 = vmul.f32 %v1912_v37, %v840_v36 }
 0x487   :  { %v2521_v42 = vadd.f32 %v845_v29, %v841_v38  ;;  %v2577_v38 = vld [vmem:[#allocation10] ss:$12 sps:$4 sm:$0xff]  }
 0x489   :  { %v847_v43 = vpack.c.bf16 %v2521_v42, %v2521_v42  ;;  %v2527_v27 = vsel %vm1331_vm4, %v2479_v45, %v2521_v42  ;;  %v964_v61 = vrot.slane %v2521_v42, 7  ;;  %v2581_v42 = vld [vmem:[#allocation10 + $0x1c] ss:$12 sps:$4 sm:$0xff]  }
 0x48b   :  { %v849_v40 = vshrl.u32 %v847_v43, 16  ;;  %v2588_v43 = vld [vmem:[#allocation10 + $0x18] ss:$12 sps:$4 sm:$0xff]  }
 0x48d   :  { %v851_v44 = vrot.slane %v849_v40, 1 }
 0x48f   :  { %886 = vmatmul.mubr.bf16.vlgmr.msra.gmra.mrb[16].mxu0 %v851_v44  ;;  %1733 = vmatmul.mubr.bf16.vlgmr.msra.gmra.mrb[24].mxu1 %v851_v44 }
 0x490   :  { %973 = vmatpush1.bf16.msra.mxu0 %v2236_v2  ;;  %1737 = vmatpush3.bf16.msra.mxu1 %v2273_v19 }
 0x491   :  { %974 = vmatprep.subr.bf16.mxu0 %v2239_v3  ;;  %1738 = vmatprep.subr.bf16.mxu1 %v2124_v12 }
 0x492   :  { %1004 = vmatprep.mubr.bf16.mxu0 %v2123_v0  ;;  %1752 = vmatprep.mubr.msk.bf16.mxu1 %vm2125_vm1, %v2124_v12 }
 0x494   :  { %975 = vmatpush1.bf16.msra.mxu0 %v2242_v4  ;;  %1739 = vmatpush3.bf16.msra.mxu1 %v2283_v22 }
 0x495   :  { %976 = vmatprep.subr.bf16.mxu0 %v2244_v5  ;;  %1740 = vmatprep.subr.bf16.mxu1 %v2124_v12 }
 0x498   :  { %977 = vmatpush1.bf16.msra.mxu0 %v2248_v9  ;;  %1741 = vmatpush3.bf16.msra.mxu1 %v2293_v25 }
 0x499   :  { %978 = vmatprep.subr.bf16.mxu0 %v2251_v11  ;;  %1742 = vmatprep.subr.bf16.mxu1 %v2124_v12 }
 0x49c   :  { %979 = vmatpush1.bf16.msra.mxu0 %v2255_v14  ;;  %1743 = vmatpush3.bf16.msra.mxu1 %v2305_v28 }
 0x49d   :  { %980 = vmatprep.subr.bf16.mxu0 %v2259_v15  ;;  %1744 = vmatprep.subr.bf16.mxu1 %v2124_v12 }
 0x4a0   :  { %981 = vmatpush1.bf16.msra.mxu0 %v2264_v16  ;;  %1745 = vmatpush3.bf16.msra.mxu1 %v2312_v30 }
 0x4a1   :  { %982 = vmatprep.subr.bf16.mxu0 %v2267_v17  ;;  %1746 = vmatprep.subr.bf16.mxu1 %v2124_v12 }
 0x4a4   :  { %983 = vmatpush1.bf16.msra.mxu0 %v2275_v20  ;;  %1747 = vmatpush3.bf16.msra.mxu1 %v2319_v31 }
 0x4a5   :  { %984 = vmatprep.subr.bf16.mxu0 %v2279_v21  ;;  %1748 = vmatprep.subr.bf16.mxu1 %v2124_v12 }
 0x4a8   :  { %985 = vmatpush1.bf16.msra.mxu0 %v2285_v23  ;;  %1749 = vmatpush3.bf16.msra.mxu1 %v2325_v32 }
 0x4a9   :  { %986 = vmatprep.subr.bf16.mxu0 %v2290_v24  ;;  %1750 = vmatprep.subr.bf16.mxu1 %v2124_v12 }
 0x4ac   :  { %987 = vmatpush1.bf16.msra.mxu0 %v2297_v26  ;;  %1751 = vmatpush3.bf16.msra.mxu1 %v2331_v33 }
 0x4ad   :  { %1093 = vmatprep.subr.bf16.mxu0 %v2234_v1  ;;  %1756 = vmatprep.subr.bf16.mxu1 %v2124_v12 }
 0x562   :  { %v887_v2 = vpop.f32.mrb[16].mxu0  ;;  %v928_v3 = vpop.f32.mrb[24].mxu1 }
 0x563   :  { %v935_v4 = vrot.slane %v887_v2, 4  ;;  %v889_v5 = vpop.f32.mrb[17].mxu0  ;;  %v1734_v45 = vpop.f32.mrb[25].mxu1  ;;  %v954_v58 = vadd.f32 %v928_v3, %v2377_v10 }
 0x564   :  { %v945_v41 = vrot.slane %v889_v5, 4  ;;  %v891_v39 = vpop.f32.mrb[18].mxu0  ;;  %v931_v46 = vpop.f32.mrb[26].mxu1 }
 0x565   :  { %v937_v47 = vadd.f32 %v935_v4, %v2368_v49  ;;  %v892_v48 = vpop.f32.mrb[19].mxu0  ;;  %v1735_v50 = vpop.f32.mrb[27].mxu1  ;;  %v956_v59 = vrot.slane %v954_v58, 4 }
 0x566   :  { %v947_v51 = vadd.f32 %v945_v41, %v2371_v53 }
 0x567   :  { %v1530_v52 = vmul.f32 -1.442695, %v937_v47 }
 0x568   :  { %v1531_v54 = vmul.f32 -1.442695, %v947_v51 }
 0x569   :  { %1913 = vpow2.f32 %v1530_v52 }
 0x56a   :  { %1915 = vpow2.f32 %v1531_v54 }
 0x573   :  { %v1914_v1 = vpop.eup %1913 }
 0x574   :  { %v1916_v55 = vpop.eup %1915  ;;  %v941_v56 = vadd.f32 1.0, %v1914_v1 }
 0x575   :  { %v951_v57 = vadd.f32 1.0, %v1916_v55 }
 0x576   :  { %1917 = vrcp.f32 %v941_v56 }
 0x577   :  { %1919 = vrcp.f32 %v951_v57 }
 0x580   :  { %v1918_v60 = vpop.eup %1917 }
 0x581   :  { %v1920_v62 = vpop.eup %1919  ;;  %v958_v63 = vmul.f32 %v1918_v60, %v956_v59  ;;  %v1958_v59 = vld [vmem:[#allocation10 + $0x8] ss:$12 sps:$4 sm:$0xff]   ;;  %v1959_v60 = vld [vmem:[#allocation10 + $0x20] ss:$12 sps:$4 sm:$0xff]  }
 0x582   :  { %v966_v6 = vmul.f32 %v1920_v62, %v964_v61  ;;  %v961_v8 = vsub.f32 1.0, %v1920_v62  ;;  %v1960_v61 = vld [vmem:[#allocation10 + $0x30] ss:$12 sps:$4 sm:$0xff]   ;;  %v1961_v62 = vld [vmem:[#allocation10 + $0x38] ss:$12 sps:$4 sm:$0xff]  }
 0x583   :  { %v959_v7 = vadd.f32 %v958_v63, %v2380_v35  ;;  %v1962_v63 = vld [vmem:[#allocation10 + $0x4c] ss:$12 sps:$4 sm:$0xff]  }
 0x585   :  { %1921 = vtanh.f32 %v959_v7  ;;  %v1965_v7 = vld [vmem:[#allocation10 + $0x60] ss:$12 sps:$4 sm:$0xff]  }
 0x58f   :  { %v1922_v13 = vpop.eup %1921 }
 0x590   :  { %v962_v18 = vmul.f32 %v1922_v13, %v961_v8  ;;  %v1966_v8 = vld [vmem:[#allocation10 + $0x7c] ss:$12 sps:$4 sm:$0xff]   ;;  %v1967_v13 = vld [vmem:[#allocation10 + $0x78] ss:$12 sps:$4 sm:$0xff]  }
 0x592   :  { %v2569_v29 = vadd.f32 %v966_v6, %v962_v18  ;;  %v1964_v6 = vld [vmem:[#allocation10 + $0x64] ss:$12 sps:$4 sm:$0xff]   ;;  %v1968_v18 = vld [vmem:[#allocation10 + $0x94] ss:$12 sps:$4 sm:$0xff]  }
 0x594   :  { %v968_v34 = vpack.c.bf16 %v2569_v29, %v2569_v29  ;;  %v2575_v36 = vsel %vm1333_vm5, %v2527_v27, %v2569_v29  ;;  %v2592_v27 = vld [vmem:[#allocation10 + $0x34] ss:$12 sps:$4 sm:$0xff]   ;;  %v1083_v39 = vrot.slane %v2569_v29, 7  ;;  %v1970_v29 = vld [vmem:[#allocation10 + $0xac] ss:$12 sps:$4 sm:$0xff]  }
 0x596   :  { %v970_v37 = vrot.slane %v968_v34, 2 }
 0x598   :  { %1005 = vmatmul.mubr.bf16.vlgmr.msra.gmra.mrb[20].mxu0 %v970_v37  ;;  %1753 = vmatmul.mubr.bf16.vlgmr.msra.gmra.mrb[28].mxu1 %v970_v37 }
 0x599   :  { %1094 = vmatpush1.bf16.msra.mxu0 %v2577_v38  ;;  %1757 = vmatpush3.bf16.msra.mxu1 %v2273_v19 }
 0x59a   :  { %1095 = vmatprep.subr.bf16.mxu0 %v2581_v42  ;;  %1758 = vmatprep.subr.bf16.mxu1 %v2124_v12 }
 0x59b   :  { %1125 = vmatprep.mubr.bf16.mxu0 %v2123_v0  ;;  %1772 = vmatprep.mubr.msk.bf16.mxu1 %vm2125_vm1, %v2124_v12 }
 0x59d   :  { %1096 = vmatpush1.bf16.msra.mxu0 %v2588_v43  ;;  %1759 = vmatpush3.bf16.msra.mxu1 %v2283_v22 }
 0x59e   :  { %1097 = vmatprep.subr.bf16.mxu0 %v2592_v27  ;;  %1760 = vmatprep.subr.bf16.mxu1 %v2124_v12 }
 0x5a1   :  { %1098 = vmatpush1.bf16.msra.mxu0 %v2248_v9  ;;  %1761 = vmatpush3.bf16.msra.mxu1 %v2293_v25  ;;  %v1957_v9 = vld [vmem:[#allocation10 + $0x4] ss:$12 sps:$4 sm:$0xff]  }
 0x5a2   :  { %1099 = vmatprep.subr.bf16.mxu0 %v2251_v11  ;;  %1762 = vmatprep.subr.bf16.mxu1 %v2124_v12 }
 0x5a5   :  { %1100 = vmatpush1.bf16.msra.mxu0 %v2255_v14  ;;  %1763 = vmatpush3.bf16.msra.mxu1 %v2305_v28 }
 0x5a6   :  { %1101 = vmatprep.subr.bf16.mxu0 %v2259_v15  ;;  %1764 = vmatprep.subr.bf16.mxu1 %v2124_v12 }
 0x5a9   :  { %1102 = vmatpush1.bf16.msra.mxu0 %v2264_v16  ;;  %1765 = vmatpush3.bf16.msra.mxu1 %v2312_v30 }
 0x5aa   :  { %1103 = vmatprep.subr.bf16.mxu0 %v2267_v17  ;;  %1766 = vmatprep.subr.bf16.mxu1 %v2124_v12 }
 0x5ad   :  { %1104 = vmatpush1.bf16.msra.mxu0 %v2275_v20  ;;  %1767 = vmatpush3.bf16.msra.mxu1 %v2319_v31 }
 0x5ae   :  { %1105 = vmatprep.subr.bf16.mxu0 %v2279_v21  ;;  %1768 = vmatprep.subr.bf16.mxu1 %v2124_v12 }
 0x5b1   :  { %1106 = vmatpush1.bf16.msra.mxu0 %v2285_v23  ;;  %1769 = vmatpush3.bf16.msra.mxu1 %v2325_v32 }
 0x5b2   :  { %1107 = vmatprep.subr.bf16.mxu0 %v2290_v24  ;;  %1770 = vmatprep.subr.bf16.mxu1 %v2124_v12 }
 0x5b5   :  { %1108 = vmatpush1.bf16.msra.mxu0 %v2297_v26  ;;  %1771 = vmatpush3.bf16.msra.mxu1 %v2331_v33 }
 0x5b6   :  { %1212 = vmatprep.subr.bf16.mxu0 %v1957_v9  ;;  %1776 = vmatprep.subr.bf16.mxu1 %v2124_v12 }
 0x66b   :  { %v1006_v11 = vpop.f32.mrb[20].mxu0  ;;  %v1047_v14 = vpop.f32.mrb[28].mxu1 }
 0x66c   :  { %v1054_v15 = vrot.slane %v1006_v11, 3  ;;  %v1008_v16 = vpop.f32.mrb[21].mxu0  ;;  %v1754_v17 = vpop.f32.mrb[29].mxu1  ;;  %v1073_v5 = vadd.f32 %v1047_v14, %v2377_v10 }
 0x66d   :  { %v1064_v19 = vrot.slane %v1008_v16, 3  ;;  %v1010_v20 = vpop.f32.mrb[22].mxu0  ;;  %v1050_v21 = vpop.f32.mrb[30].mxu1 }
 0x66e   :  { %v1056_v22 = vadd.f32 %v1054_v15, %v2368_v49  ;;  %v1011_v23 = vpop.f32.mrb[23].mxu0  ;;  %v1755_v24 = vpop.f32.mrb[31].mxu1  ;;  %v1075_v45 = vrot.slane %v1073_v5, 3 }
 0x66f   :  { %v1066_v25 = vadd.f32 %v1064_v19, %v2371_v53 }
 0x670   :  { %v1532_v26 = vmul.f32 -1.442695, %v1056_v22 }
 0x671   :  { %v1533_v40 = vmul.f32 -1.442695, %v1066_v25 }
 0x672   :  { %1923 = vpow2.f32 %v1532_v26 }
 0x673   :  { %1925 = vpow2.f32 %v1533_v40 }
 0x67c   :  { %v1924_v44 = vpop.eup %1923 }
 0x67d   :  { %v1926_v2 = vpop.eup %1925  ;;  %v1060_v3 = vadd.f32 1.0, %v1924_v44 }
 0x67e   :  { %v1070_v4 = vadd.f32 1.0, %v1926_v2 }
 0x67f   :  { %1927 = vrcp.f32 %v1060_v3 }
 0x680   :  { %1929 = vrcp.f32 %v1070_v4 }
 0x689   :  { %v1928_v41 = vpop.eup %1927 }
 0x68a   :  { %v1930_v46 = vpop.eup %1929  ;;  %v1077_v47 = vmul.f32 %v1928_v41, %v1075_v45 }
 0x68b   :  { %v1085_v48 = vmul.f32 %v1930_v46, %v1083_v39  ;;  %v1080_v51 = vsub.f32 1.0, %v1930_v46  ;;  %v1865_v39 = vld [vmem:[#allocation11] sm:$0xff]   ;;  %v1866_v46 = vld [vmem:[#allocation11 + $0x8] sm:$0xff]  }
 0x68c   :  { %v1078_v50 = vadd.f32 %v1077_v47, %v2380_v35  ;;  %v1867_v47 = vld [vmem:[#allocation11 + $0x10] sm:$0xff]  }
 0x68e   :  { %1931 = vtanh.f32 %v1078_v50  ;;  %v1869_v50 = vld [vmem:[#allocation11 + $0x20] sm:$0xff]  }
 0x698   :  { %v1932_v52 = vpop.eup %1931 }
 0x699   :  { %v1081_v54 = vmul.f32 %v1932_v52, %v1080_v51  ;;  %v1870_v51 = vld [vmem:[#allocation11 + $0x28] sm:$0xff]   ;;  %v1871_v52 = vld [vmem:[#allocation11 + $0x30] sm:$0xff]  }
 0x69b   :  { %v2624_v1 = vadd.f32 %v1085_v48, %v1081_v54  ;;  %v1868_v48 = vld [vmem:[#allocation11 + $0x18] sm:$0xff]  }
 0x69c   :  { %v1872_v54 = vld [vmem:[#allocation11 + $0x38] sm:$0xff]  }
 0x69d   :  { %v1087_v55 = vpack.c.bf16 %v2624_v1, %v2624_v1  ;;  %v2630_v56 = vsel %vm1335_vm6, %v2575_v36, %v2624_v1  ;;  %v1204_v24 = vrot.slane %v2624_v1, 7 }
 0x69f   :  { %v1089_v57 = vshrl.u32 %v1087_v55, 16 }
 0x6a1   :  { %v1091_v58 = vrot.slane %v1089_v57, 2 }
 0x6a3   :  { %1126 = vmatmul.mubr.bf16.vlgmr.msra.gmra.mrb[24].mxu0 %v1091_v58  ;;  %1773 = vmatmul.mubr.bf16.vlgmr.msra.gmra.mrb[32].mxu1 %v1091_v58 }
 0x6a4   :  { %1213 = vmatpush1.bf16.msra.mxu0 %v2577_v38  ;;  %1777 = vmatpush3.bf16.msra.mxu1 %v1958_v59 }
 0x6a5   :  { %1214 = vmatprep.subr.bf16.mxu0 %v2581_v42  ;;  %1778 = vmatprep.subr.bf16.mxu1 %v2124_v12 }
 0x6a6   :  { %1244 = vmatprep.mubr.bf16.mxu0 %v2123_v0  ;;  %1792 = vmatprep.mubr.msk.bf16.mxu1 %vm2125_vm1, %v2124_v12  ;;  %v1963_v0 = vld [vmem:[#allocation10 + $0x48] ss:$12 sps:$4 sm:$0xff]  }
 0x6a8   :  { %1215 = vmatpush1.bf16.msra.mxu0 %v2588_v43  ;;  %1779 = vmatpush3.bf16.msra.mxu1 %v1959_v60 }
 0x6a9   :  { %1216 = vmatprep.subr.bf16.mxu0 %v2592_v27  ;;  %1780 = vmatprep.subr.bf16.mxu1 %v2124_v12 }
 0x6ac   :  { %1217 = vmatpush1.bf16.msra.mxu0 %v1960_v61  ;;  %1781 = vmatpush3.bf16.msra.mxu1 %v1961_v62 }
 0x6ad   :  { %1218 = vmatprep.subr.bf16.mxu0 %v1962_v63  ;;  %1782 = vmatprep.subr.bf16.mxu1 %v2124_v12 }
 0x6b0   :  { %1219 = vmatpush1.bf16.msra.mxu0 %v1963_v0  ;;  %1783 = vmatpush3.bf16.msra.mxu1 %v2305_v28  ;;  %v1969_v28 = vld [vmem:[#allocation10 + $0x90] ss:$12 sps:$4 sm:$0xff]  }
 0x6b1   :  { %1220 = vmatprep.subr.bf16.mxu0 %v1964_v6  ;;  %1784 = vmatprep.subr.bf16.mxu1 %v2124_v12 }
 0x6b4   :  { %1221 = vmatpush1.bf16.msra.mxu0 %v1965_v7  ;;  %1785 = vmatpush3.bf16.msra.mxu1 %v2312_v30  ;;  %v1971_v30 = vld [vmem:[#allocation10 + $0xa8] ss:$12 sps:$4 sm:$0xff]  }
 0x6b5   :  { %1222 = vmatprep.subr.bf16.mxu0 %v1966_v8  ;;  %1786 = vmatprep.subr.bf16.mxu1 %v2124_v12 }
 0x6b8   :  { %1223 = vmatpush1.bf16.msra.mxu0 %v1967_v13  ;;  %1787 = vmatpush3.bf16.msra.mxu1 %v2319_v31 }
 0x6b9   :  { %1224 = vmatprep.subr.bf16.mxu0 %v1968_v18  ;;  %1788 = vmatprep.subr.bf16.mxu1 %v2124_v12 }
 0x6bc   :  { %1225 = vmatpush1.bf16.msra.mxu0 %v1969_v28  ;;  %1789 = vmatpush3.bf16.msra.mxu1 %v2325_v32 }
 0x6bd   :  { %1226 = vmatprep.subr.bf16.mxu0 %v1970_v29  ;;  %1790 = vmatprep.subr.bf16.mxu1 %v2124_v12  ;;  %v1972_v29 = vld [vmem:[%s2708_s5] sm:$0x1]  ;;  %s2126_s5 = smov [#allocation14]  }
 0x6be   :  { %s1478_s22 = sshll.u32 %s2126_s5, 4  ;;  %s1479_s22 = int_to_ptr.vmem [resolvable:$true] %s1478_s22 }
 0x6bf   :  { %s2061_s23 = scalar_lea.vmem %s1479_s22, 16  ;;  %s2065_s25 = scalar_lea.vmem %s1479_s22, 32 }
 0x6c0   :  { %1227 = vmatpush1.bf16.msra.mxu0 %v1971_v30  ;;  %1791 = vmatpush3.bf16.msra.mxu1 %v2331_v33  ;;  %p2062_p4 = scmp.ne.s32.totalorder %s1479_s22, %s2061_s23  ;;  %p2066_p5 = scmp.lt.s32.totalorder %s1479_s22, %s1479_s22 }
 0x6c1   :  { %1796 = vmatprep.subr.bf16.mxu0 %v2124_v12  ;;  %p2067_p6 = scmp.lt.s32.totalorder %s2065_s25, %s2061_s23 }
 0x6c3   :  { %p2068_p7 = por %p2067_p6, %p2066_p5 }
 0x6c5   :  { %p2069_p8 = pnand %p2068_p7, %p2062_p4 }
 0x776   :  { %v1127_v34 = vpop.f32.mrb[24].mxu0  ;;  %v1168_v31 = vpop.f32.mrb[32].mxu1 }
 0x777   :  { %v1175_v36 = vrot.slane %v1127_v34, 2  ;;  %v1129_v37 = vpop.f32.mrb[25].mxu0  ;;  %v1774_v38 = vpop.f32.mrb[33].mxu1  ;;  %v1194_v21 = vadd.f32 %v1168_v31, %v2377_v10 }
 0x778   :  { %v1185_v42 = vrot.slane %v1129_v37, 2  ;;  %v1131_v43 = vpop.f32.mrb[26].mxu0  ;;  %v1171_v27 = vpop.f32.mrb[34].mxu1 }
 0x779   :  { %v1177_v32 = vadd.f32 %v1175_v36, %v2368_v49  ;;  %v1132_v9 = vpop.f32.mrb[27].mxu0  ;;  %v1775_v11 = vpop.f32.mrb[35].mxu1  ;;  %v1196_v22 = vrot.slane %v1194_v21, 2 }
 0x77a   :  { %v1187_v14 = vadd.f32 %v1185_v42, %v2371_v53 }
 0x77b   :  { %v1534_v15 = vmul.f32 -1.442695, %v1177_v32 }
 0x77c   :  { %v1535_v16 = vmul.f32 -1.442695, %v1187_v14 }
 0x77d   :  { %1933 = vpow2.f32 %v1534_v15 }
 0x77e   :  { %1935 = vpow2.f32 %v1535_v16 }
 0x787   :  { %v1934_v33 = vpop.eup %1933 }
 0x788   :  { %v1936_v17 = vpop.eup %1935  ;;  %v1181_v19 = vadd.f32 1.0, %v1934_v33 }
 0x789   :  { %v1191_v20 = vadd.f32 1.0, %v1936_v17 }
 0x78a   :  { %1937 = vrcp.f32 %v1181_v19 }
 0x78b   :  { %1939 = vrcp.f32 %v1191_v20 }
 0x794   :  { %v1938_v23 = vpop.eup %1937 }
 0x795   :  { %v1940_v25 = vpop.eup %1939  ;;  %v1198_v26 = vmul.f32 %v1938_v23, %v1196_v22 }
 0x796   :  { %v1206_v40 = vmul.f32 %v1940_v25, %v1204_v24  ;;  %v1201_v2 = vsub.f32 1.0, %v1940_v25 }
 0x797   :  { %v1199_v44 = vadd.f32 %v1198_v26, %v2380_v35 }
 0x799   :  { %1941 = vtanh.f32 %v1199_v44 }
 0x7a3   :  { %v1942_v3 = vpop.eup %1941 }
 0x7a4   :  { %v1202_v4 = vmul.f32 %v1942_v3, %v1201_v2 }
 0x7a6   :  { %v1207_v5 = vadd.f32 %v1206_v40, %v1202_v4 }
 0x7a8   :  { %v1208_v45 = vpack.c.bf16 %v1207_v5, %v1207_v5  ;;  %v2658_v41 = vsel %vm1337_vm7, %v2630_v56, %v1207_v5  ;;  %v1323_v31 = vrot.slane %v1207_v5, 7 }
 0x7aa   :  { %v1210_v10 = vrot.slane %v1208_v45, 3 }
 0x7ac   :  { %1245 = vmatmul.mubr.bf16.vlgmr.msra.gmra.mrb[28].mxu0 %v1210_v10  ;;  %1793 = vmatmul.mubr.bf16.vlgmr.msra.gmra.mrb[36].mxu1 %v1210_v10 }
 0x7ad   :  { %1812 = vmatprep.mubr.msk.bf16.mxu0 %vm2125_vm1, %v2124_v12  ;;  %1797 = vmatpush3.bf16.msra.mxu0 %v1865_v39 }
 0x7ae   :  { %1798 = vmatprep.subr.bf16.mxu0 %v2124_v12 }
 0x7b1   :  { %1799 = vmatpush3.bf16.msra.mxu0 %v1866_v46 }
 0x7b2   :  { %1800 = vmatprep.subr.bf16.mxu0 %v2124_v12 }
 0x7b5   :  { %1801 = vmatpush3.bf16.msra.mxu0 %v1867_v47 }
 0x7b6   :  { %1802 = vmatprep.subr.bf16.mxu0 %v2124_v12 }
 0x7b9   :  { %1803 = vmatpush3.bf16.msra.mxu0 %v1868_v48 }
 0x7ba   :  { %1804 = vmatprep.subr.bf16.mxu0 %v2124_v12 }
 0x7bd   :  { %1805 = vmatpush3.bf16.msra.mxu0 %v1869_v50 }
 0x7be   :  { %1806 = vmatprep.subr.bf16.mxu0 %v2124_v12 }
 0x7c1   :  { %1807 = vmatpush3.bf16.msra.mxu0 %v1870_v51 }
 0x7c2   :  { %1808 = vmatprep.subr.bf16.mxu0 %v2124_v12 }
 0x7c5   :  { %1809 = vmatpush3.bf16.msra.mxu0 %v1871_v52 }
 0x7c6   :  { %1810 = vmatprep.subr.bf16.mxu0 %v2124_v12 }
 0x7c9   :  { %1811 = vmatpush3.bf16.msra.mxu0 %v1872_v54 }
 0x87f   :  { %v1246_v1 = vpop.f32.mrb[28].mxu0  ;;  %v1287_v55 = vpop.f32.mrb[36].mxu1 }
 0x880   :  { %v1294_v56 = vrot.slane %v1246_v1, 1  ;;  %v1248_v57 = vpop.f32.mrb[29].mxu0  ;;  %v1794_v58 = vpop.f32.mrb[37].mxu1  ;;  %v1313_v30 = vadd.f32 %v1972_v29, %v1287_v55 }
 0x881   :  { %v1304_v59 = vrot.slane %v1248_v57, 1  ;;  %v1250_v60 = vpop.f32.mrb[30].mxu0  ;;  %v1290_v61 = vpop.f32.mrb[38].mxu1 }
 0x882   :  { %v1296_v62 = vadd.f32 %v1294_v56, %v2368_v49  ;;  %v1251_v63 = vpop.f32.mrb[31].mxu0  ;;  %v1795_v0 = vpop.f32.mrb[39].mxu1  ;;  %v1315_v49 = vrot.slane %v1313_v30, 1 }
 0x883   :  { %v1306_v6 = vadd.f32 %v1304_v59, %v2371_v53 }
 0x884   :  { %v1536_v7 = vmul.f32 -1.442695, %v1296_v62 }
 0x885   :  { %v1537_v8 = vmul.f32 -1.442695, %v1306_v6 }
 0x886   :  { %1943 = vpow2.f32 %v1536_v7 }
 0x887   :  { %1945 = vpow2.f32 %v1537_v8 }
 0x890   :  { %v1944_v12 = vpop.eup %1943 }
 0x891   :  { %v1946_v13 = vpop.eup %1945  ;;  %v1300_v18 = vadd.f32 1.0, %v1944_v12 }
 0x892   :  { %v1310_v28 = vadd.f32 1.0, %v1946_v13 }
 0x893   :  { %1947 = vrcp.f32 %v1300_v18 }
 0x894   :  { %1949 = vrcp.f32 %v1310_v28 }
 0x89d   :  { %v1948_v34 = vpop.eup %1947 }
 0x89e   :  { %v1950_v36 = vpop.eup %1949  ;;  %v1317_v53 = vmul.f32 %v1948_v34, %v1315_v49 }
 0x89f   :  { %v1325_v37 = vmul.f32 %v1950_v36, %v1323_v31  ;;  %v1320_v42 = vsub.f32 1.0, %v1950_v36 }
 0x8a0   :  { %v1318_v38 = vadd.f32 %v1317_v53, %v2380_v35 }
 0x8a2   :  { %1951 = vtanh.f32 %v1318_v38 }
 0x8ac   :  { %v1952_v43 = vpop.eup %1951 }
 0x8ad   :  { %v1321_v27 = vmul.f32 %v1952_v43, %v1320_v42 }
 0x8af   :  { %v1326_v32 = vadd.f32 %v1325_v37, %v1321_v27 }
 0x8b1   :  { %v1340_v9 = vsel %vm1339_vm8, %v2658_v41, %v1326_v32  ;;  %1342 = vst [vmem:[#allocation4 - $0x7] sm:$0x80] %v1326_v32 }
 0x8b2   :  { %1341 = vst [vmem:[#allocation3] sm:$0xff] %v1340_v9  ;;  %v1344_v11 = vpack.c.bf16 %v1340_v9, %v1340_v9 }
 0x8b4   :  { %1813 = vmatmul.mubr.bf16.vlgmr.msra.gmra.mrb[32].mxu0 %v1344_v11 }
 0x8b9   :  { %v1460_v14 = vld [vmem:[#allocation3 + $0x7] sm:$0x1] }
 0x8ba   :  { %1461 = vst [vmem:[#allocation14] sm:$0x1] %v1460_v14 }
 0x8bb   :  { %2072 = shalt.err (!%p2069_p8)
}
 0x8bc   :  { %s2073_s27 = scalar_lea.hbm %s2712_s9, 16 }
 0x8bd   :  { %p2074_p9 = scmp.ne.s32.totalorder %s2712_s9, %s2073_s27  ;;  %p2077_p10 = scmp.lt.u32.totalorder %s2073_s27, %s2712_s9 }
 0x8bf   :  { %p2079_p11 = pnand %p2077_p10, %p2074_p9 }
 0x8c1   :  { %2082 = shalt.err (!%p2079_p11)
}
 0x8c2   :  { %1481 = dma.vmem_to_hbm [thread:$0]  %s1479_s22, 16, %s2712_s9, [#allocation15]   ;;  %v1538_v35 = vld [vmem:[%s2710_s7] ss:$0 sm:$0xff] }
 0x8c3   :  { %s2127_s14 = smov [#allocation13]  }
 0x8c4   :  { %s1468_s3 = sshll.u32 %s2127_s14, 4  ;;  %s1469_s3 = int_to_ptr.vmem [resolvable:$true] %s1468_s3 }
 0x8c5   :  { %s2083_s19 = scalar_lea.vmem %s1469_s3, 128  ;;  %p2088_p13 = scmp.lt.s32.totalorder %s1469_s3, %s1469_s3 }
 0x8c6   :  { %p2084_p12 = scmp.ne.s32.totalorder %s1469_s3, %s2083_s19  ;;  %p2089_p0 = scmp.lt.s32.totalorder %s2083_s19, %s2083_s19 }
 0x8c8   :  { %p2090_p1 = por %p2089_p0, %p2088_p13 }
 0x8ca   :  { %p2091_p2 = pnand %p2090_p1, %p2084_p12 }
 0x987   :  { %v1450_v15 = vpop.f32.mrb[32].mxu0 }
 0x988   :  { %v1451_v16 = vadd.f32 %v1538_v35, %v1450_v15  ;;  %v1814_v33 = vpop.f32.mrb[33].mxu0 }
 0x989   :  { %v1453_v17 = vpop.f32.mrb[34].mxu0 }
 0x98a   :  { %1456 = vst [vmem:[#allocation13] sm:$0xff] %v1451_v16  ;;  %v1815_v19 = vpop.f32.mrb[35].mxu0 }
 0x98b   :  { %2094 = shalt.err (!%p2091_p2)
}
 0x98c   :  { %s2095_s7 = scalar_lea.hbm %s2711_s8, 128 }
 0x98d   :  { %p2096_p3 = scmp.ne.s32.totalorder %s2711_s8, %s2095_s7  ;;  %p2099_p4 = scmp.lt.u32.totalorder %s2095_s7, %s2711_s8 }
 0x98f   :  { %p2101_p5 = pnand %p2099_p4, %p2096_p3 }
 0x991   :  { %2104 = shalt.err (!%p2101_p5)
}
 0x992   :  { %1471 = dma.vmem_to_hbm [thread:$0]  %s1469_s3, 128, %s2711_s8, [#allocation7]  }
 0x993   :  { %2111 = dma.done.wait [#allocation7], 128  }
 0x994   :  { %2112 = vsyncadd [#allocation7], 4294967168 }
 0x995   :  { %2113 = dma.done.wait [#allocation15], 16  }
 0x996   :  { %2114 = vsyncadd [#allocation15], 4294967280 }
 0x997   :  { %1488 = vsyncpa [#allocation6], 1 }
 0x998   :  { %1489 = vsyncpa [#allocation9], 1 }
 0x999   :  { %1490 = vsyncpa [#allocation12], 1 }
 0x99a   :  { %1491 = vsyncpa [#allocation7], 1 }
 0x99b   :  { %1492 = vsyncpa [#allocation15], 1 }

</bundles_post_ra>
